<compile_context>
chip_gen: v7x
topology: tpu7x:2x2x1
jax: 0.10.0
libtpu: 0.0.40
codegen_flags: <defaults>
</compile_context>

<pallas_src>
import math
import functools

import numpy as np
import jax
import jax.numpy as jnp
from jax.experimental import pallas as pl
from jax.experimental.pallas import tpu as pltpu


MXU_DTYPE = jnp.bfloat16   # MXU inputs; accumulation is always float32
LN_EPS = 1e-5


# ------------------------------ small helpers -------------------------------

def _pick_tile(dim, target, align):
    """Largest tile <= target that is a multiple of `align` and divides `dim`,
    else the full dimension (full blocks always satisfy the (8,128) rule).
    NOTE: realistic transformer dims (multiples of 8/128) always hit the
    aligned-divisor path; the full-dim fallback only triggers at toy sizes."""
    if dim <= target:
        return dim
    t = (target // align) * align
    while t >= align:
        if dim % t == 0:
            return t
        t -= align
    return dim


def _nbytes(shape, dtype):
    n = 1
    for d in shape:
        n *= int(d)
    return n * np.dtype(dtype).itemsize


def _vmem_limit(block_bytes, scratch_bytes=0):
    """Scoped-VMEM request: double-buffered blocks + scratch + headroom,
    clamped to a range that is safe on v5e/v6e (128 MiB) and v7x (64 MiB)."""
    need = 2 * block_bytes + scratch_bytes + (2 << 20)
    return int(min(max(need, 8 << 20), 64 << 20))


# --------------------------- tiled linear kernels ----------------------------

def _linear_kernel_oneshot(x_ref, w_ref, b_ref, o_ref, *, activation):
    """Single-K-tile path: no reduction loop, no accumulator."""
    y = jnp.dot(x_ref[...].astype(MXU_DTYPE), w_ref[...],
                preferred_element_type=jnp.float32) + b_ref[...]
    if activation == "relu":
        y = jnp.maximum(y, 0.0)
    o_ref[...] = y.astype(o_ref.dtype)


def _linear_kernel_accout(x_ref, w_ref, b_ref, o_ref, *, activation, n_k):
    """f32 output: accumulate directly into the VMEM-resident output block."""
    @pl.when(pl.program_id(2) == 0)
    def _init():
        o_ref[...] = jnp.zeros_like(o_ref)

    o_ref[...] += jnp.dot(x_ref[...].astype(MXU_DTYPE), w_ref[...],
                          preferred_element_type=jnp.float32)

    @pl.when(pl.program_id(2) == n_k - 1)
    def _finalize():
        y = o_ref[...] + b_ref[...]
        if activation == "relu":
            y = jnp.maximum(y, 0.0)
        o_ref[...] = y


def _linear_kernel_accscratch(x_ref, w_ref, b_ref, o_ref, acc_ref, *,
                              activation, n_k):
    """Low-precision output: keep the running sum in an f32 VMEM scratch."""
    @pl.when(pl.program_id(2) == 0)
    def _init():
        acc_ref[...] = jnp.zeros_like(acc_ref)

    acc_ref[...] += jnp.dot(x_ref[...].astype(MXU_DTYPE), w_ref[...],
                            preferred_element_type=jnp.float32)

    @pl.when(pl.program_id(2) == n_k - 1)
    def _finalize():
        y = acc_ref[...] + b_ref[...]
        if activation == "relu":
            y = jnp.maximum(y, 0.0)
        o_ref[...] = y.astype(o_ref.dtype)


def pallas_linear(x, w_t, b, activation=None, out_dtype=jnp.float32,
                  tm=256, tn=256, tk=512):
    """y = x @ w_t + b.  x:(N,K) f32, w_t:(K,M) pre-transposed bf16, b:(M,)."""
    N, K = x.shape
    M = w_t.shape[1]
    tm = _pick_tile(N, tm, 8)
    tn = _pick_tile(M, tn, 128)
    tk = _pick_tile(K, tk, 128)
    n_k = K // tk
    out_is_f32 = np.dtype(out_dtype) == np.dtype(np.float32)

    scratch_shapes = []
    if n_k == 1:
        kern = functools.partial(_linear_kernel_oneshot, activation=activation)
    elif out_is_f32:
        kern = functools.partial(_linear_kernel_accout,
                                 activation=activation, n_k=n_k)
    else:
        kern = functools.partial(_linear_kernel_accscratch,
                                 activation=activation, n_k=n_k)
        scratch_shapes = [pltpu.VMEM((tm, tn), jnp.float32)]

    block_bytes = (_nbytes((tm, tk), x.dtype) + _nbytes((tk, tn), w_t.dtype)
                   + _nbytes((1, tn), jnp.float32) + _nbytes((tm, tn), out_dtype))
    scratch_bytes = _nbytes((tm, tn), jnp.float32) if scratch_shapes else 0

    return pl.pallas_call(
        kern,
        out_shape=jax.ShapeDtypeStruct((N, M), out_dtype),
        grid=(N // tm, M // tn, n_k),
        in_specs=[
            pl.BlockSpec((tm, tk), lambda i, j, k: (i, k)),
            pl.BlockSpec((tk, tn), lambda i, j, k: (k, j)),
            pl.BlockSpec((1, tn), lambda i, j, k: (0, j)),
        ],
        out_specs=pl.BlockSpec((tm, tn), lambda i, j, k: (i, j)),
        scratch_shapes=scratch_shapes,
        compiler_params=pltpu.CompilerParams(
            dimension_semantics=("parallel", "parallel", "arbitrary"),
            vmem_limit_bytes=_vmem_limit(block_bytes, scratch_bytes)),
    )(x, w_t, jnp.reshape(b, (1, M)))


# --------------- fused attention block (attn + out-proj + LN) ---------------

def _attn_block_kernel(*args, nhead, scale, eps, self_attn):
    """Per-batch fused MHA + out-proj + residual + LayerNorm.

    self_attn=True : (qkv[1,T,3E]bf16, tmask[T,T]f32, pad[1,1,T]f32, x[1,T,E],
                      wo, bo, gamma, beta, out, attn_scratch)
    self_attn=False: (q[1,T,E]bf16, kv[1,S,2E]bf16, pad[1,1,S]f32, x[1,T,E],
                      wo, bo, gamma, beta, out, attn_scratch)
    """
    if self_attn:
        (src_ref, tmask_ref, pad_ref, x_ref, wo_ref, bo_ref,
         g_ref, bln_ref, o_ref, attn_ref) = args
        E = x_ref.shape[-1]
        src = src_ref[0]                         # (T, 3E) bf16
        qv, kv_, vv = src, src, src
        q_off, k_off, v_off = 0, E, 2 * E
        mask = tmask_ref[...] + pad_ref[0]       # (T, T) additive f32
    else:
        (q_src, kv_src, pad_ref, x_ref, wo_ref, bo_ref,
         g_ref, bln_ref, o_ref, attn_ref) = args
        E = x_ref.shape[-1]
        qv = q_src[0]                            # (T, E)  bf16
        kvv = kv_src[0]                          # (S, 2E) bf16
        kv_, vv = kvv, kvv
        q_off, k_off, v_off = 0, 0, E
        mask = pad_ref[0]                        # (1, S) additive f32 (broadcasts)

    hd = E // nhead
    for h in range(nhead):
        lo = h * hd
        qh = qv[:, q_off + lo: q_off + lo + hd]          # (T, hd) bf16
        kh = kv_[:, k_off + lo: k_off + lo + hd]         # (S, hd) bf16
        vh = vv[:, v_off + lo: v_off + lo + hd]          # (S, hd) bf16
        # contract over head dim of both operands -> no K transpose
        s = jax.lax.dot_general(qh, kh, (((1,), (1,)), ((), ())),
                                preferred_element_type=jnp.float32)
        s = s * scale + mask
        # guard fully-masked rows: clamp the row max so exp(-inf - mx) -> 0, not NaN
        mx = jnp.maximum(jnp.max(s, axis=-1, keepdims=True), -1e30)
        p = jnp.exp(s - mx)
        denom = jnp.sum(p, axis=-1, keepdims=True)
        p = p * pl.reciprocal(jnp.maximum(denom, 1e-30), approx=True)
        # stream this head's PV result into the (T,E) scratch at its lane offset
        attn_ref[:, lo:lo + hd] = jnp.dot(p.astype(MXU_DTYPE), vh,
                                          preferred_element_type=jnp.float32)

    proj = jnp.dot(attn_ref[...].astype(MXU_DTYPE), wo_ref[...],
                   preferred_element_type=jnp.float32) + bo_ref[...]
    z = proj + x_ref[0]                                           # residual
    mu = jnp.mean(z, axis=-1, keepdims=True)
    zc = z - mu
    var = jnp.mean(zc * zc, axis=-1, keepdims=True)
    o_ref[0] = (zc * jax.lax.rsqrt(var + eps) * g_ref[...]
                + bln_ref[...]).astype(o_ref.dtype)


def pallas_self_attention_block(qkv, tmask, pad_add, x_res, wo, bo,
                                gamma, beta, nhead):
    """qkv:(B,T,3E) bf16 packed, tmask:(T,T) f32, pad_add:(B,1,T) f32 additive,
    x_res:(B,T,E) f32.  Returns LN(x + MHA)."""
    B, T, E3 = qkv.shape
    E = E3 // 3
    scale = 1.0 / math.sqrt(E // nhead)
    kern = functools.partial(_attn_block_kernel, nhead=nhead, scale=scale,
                             eps=LN_EPS, self_attn=True)
    block_bytes = (_nbytes((1, T, E3), qkv.dtype) + _nbytes((T, T), jnp.float32)
                   + _nbytes((1, 1, T), jnp.float32)
                   + 2 * _nbytes((1, T, E), jnp.float32)
                   + _nbytes((E, E), wo.dtype) + 3 * _nbytes((1, E), jnp.float32))
    scratch_bytes = _nbytes((T, E), jnp.float32)
    return pl.pallas_call(
        kern,
        out_shape=jax.ShapeDtypeStruct((B, T, E), jnp.float32),
        grid=(B,),
        in_specs=[
            pl.BlockSpec((1, T, E3), lambda b: (b, 0, 0)),   # packed QKV (bf16)
            pl.BlockSpec((T, T), lambda b: (0, 0)),          # attn mask
            pl.BlockSpec((1, 1, T), lambda b: (b, 0, 0)),    # key-padding row
            pl.BlockSpec((1, T, E), lambda b: (b, 0, 0)),    # residual x
            pl.BlockSpec((E, E), lambda b: (0, 0)),          # Wo
            pl.BlockSpec((1, E), lambda b: (0, 0)),          # bo
            pl.BlockSpec((1, E), lambda b: (0, 0)),          # gamma
            pl.BlockSpec((1, E), lambda b: (0, 0)),          # beta
        ],
        out_specs=pl.BlockSpec((1, T, E), lambda b: (b, 0, 0)),
        scratch_shapes=[pltpu.VMEM((T, E), jnp.float32)],
        compiler_params=pltpu.CompilerParams(
            dimension_semantics=("parallel",),
            vmem_limit_bytes=_vmem_limit(block_bytes, scratch_bytes)),
    )(qkv, tmask, pad_add, x_res, wo, bo.reshape(1, E),
      gamma.reshape(1, E), beta.reshape(1, E))


def pallas_cross_attention_block(q, kv, pad_add, x_res, wo, bo,
                                 gamma, beta, nhead):
    """q:(B,T,E) bf16, kv:(B,S,2E) bf16 packed, pad_add:(B,1,S) f32 additive,
    x_res:(B,T,E) f32.  Returns LN(x + MHA(x, mem, mem))."""
    B, T, E = q.shape
    S = kv.shape[1]
    scale = 1.0 / math.sqrt(E // nhead)
    kern = functools.partial(_attn_block_kernel, nhead=nhead, scale=scale,
                             eps=LN_EPS, self_attn=False)
    block_bytes = (_nbytes((1, T, E), q.dtype) + _nbytes((1, S, 2 * E), kv.dtype)
                   + _nbytes((1, 1, S), jnp.float32)
                   + 2 * _nbytes((1, T, E), jnp.float32)
                   + _nbytes((E, E), wo.dtype) + 3 * _nbytes((1, E), jnp.float32))
    scratch_bytes = _nbytes((T, E), jnp.float32)
    return pl.pallas_call(
        kern,
        out_shape=jax.ShapeDtypeStruct((B, T, E), jnp.float32),
        grid=(B,),
        in_specs=[
            pl.BlockSpec((1, T, E), lambda b: (b, 0, 0)),        # Q (bf16)
            pl.BlockSpec((1, S, 2 * E), lambda b: (b, 0, 0)),    # packed KV (bf16)
            pl.BlockSpec((1, 1, S), lambda b: (b, 0, 0)),        # key-padding row
            pl.BlockSpec((1, T, E), lambda b: (b, 0, 0)),        # residual x
            pl.BlockSpec((E, E), lambda b: (0, 0)),              # Wo
            pl.BlockSpec((1, E), lambda b: (0, 0)),              # bo
            pl.BlockSpec((1, E), lambda b: (0, 0)),              # gamma
            pl.BlockSpec((1, E), lambda b: (0, 0)),              # beta
        ],
        out_specs=pl.BlockSpec((1, T, E), lambda b: (b, 0, 0)),
        scratch_shapes=[pltpu.VMEM((T, E), jnp.float32)],
        compiler_params=pltpu.CompilerParams(
            dimension_semantics=("parallel",),
            vmem_limit_bytes=_vmem_limit(block_bytes, scratch_bytes)),
    )(q, kv, pad_add, x_res, wo, bo.reshape(1, E),
      gamma.reshape(1, E), beta.reshape(1, E))


# ---------------------- fused FFN (lin1+relu+lin2+LN) -----------------------

def _ffn_block_kernel(x_ref, w1_ref, b1_ref, w2_ref, b2_ref, g_ref, bln_ref,
                      o_ref, *, eps):
    x = x_ref[...]                                               # (tm, E) f32
    h = jnp.dot(x.astype(MXU_DTYPE), w1_ref[...],
                preferred_element_type=jnp.float32) + b1_ref[...]
    h = jnp.maximum(h, 0.0)
    y = jnp.dot(h.astype(MXU_DTYPE), w2_ref[...],
                preferred_element_type=jnp.float32) + b2_ref[...]
    z = x + y                                                    # residual
    mu = jnp.mean(z, axis=-1, keepdims=True)
    zc = z - mu
    var = jnp.mean(zc * zc, axis=-1, keepdims=True)
    o_ref[...] = (zc * jax.lax.rsqrt(var + eps) * g_ref[...]
                  + bln_ref[...]).astype(o_ref.dtype)


def pallas_ffn(x, w1, b1, w2, b2, gamma, beta, tm=256):
    """LayerNorm(x + relu(x@w1+b1)@w2+b2).  x:(N,E); w1:(E,DFF), w2:(DFF,E) bf16."""
    N, E = x.shape
    DFF = w1.shape[1]
    tm = _pick_tile(N, tm, 8)
    kern = functools.partial(_ffn_block_kernel, eps=LN_EPS)
    block_bytes = (2 * _nbytes((tm, E), jnp.float32)
                   + _nbytes((E, DFF), w1.dtype) + _nbytes((DFF, E), w2.dtype)
                   + _nbytes((1, DFF), jnp.float32) + 3 * _nbytes((1, E), jnp.float32))
    return pl.pallas_call(
        kern,
        out_shape=jax.ShapeDtypeStruct((N, E), jnp.float32),
        grid=(N // tm,),
        in_specs=[
            pl.BlockSpec((tm, E), lambda i: (i, 0)),
            pl.BlockSpec((E, DFF), lambda i: (0, 0)),
            pl.BlockSpec((1, DFF), lambda i: (0, 0)),
            pl.BlockSpec((DFF, E), lambda i: (0, 0)),
            pl.BlockSpec((1, E), lambda i: (0, 0)),
            pl.BlockSpec((1, E), lambda i: (0, 0)),
            pl.BlockSpec((1, E), lambda i: (0, 0)),
        ],
        out_specs=pl.BlockSpec((tm, E), lambda i: (i, 0)),
        compiler_params=pltpu.CompilerParams(
            dimension_semantics=("parallel",),
            vmem_limit_bytes=_vmem_limit(block_bytes)),
    )(x, w1, b1.reshape(1, DFF), w2, b2.reshape(1, E),
      gamma.reshape(1, E), beta.reshape(1, E))


# ------------------------------- model glue --------------------------------

def decoder_layer_apply(x, memory_bf, lp, nhead, tmask, self_pad, cross_pad):
    """Post-norm (PyTorch default) TransformerDecoderLayer, relu activation."""
    B, T, E = x.shape
    S = memory_bf.shape[1]

    # self-attention: one fused QKV projection, packed bf16 output fed directly
    sa = lp["self_attn"]
    qkv = pallas_linear(x.reshape(B * T, E), sa["qkv_w"], sa["qkv_b"],
                        out_dtype=MXU_DTYPE).reshape(B, T, 3 * E)
    x = pallas_self_attention_block(qkv, tmask, self_pad, x,
                                    sa["out_w"], sa["out_b"],
                                    lp["norm1_g"], lp["norm1_b"], nhead)

    # cross-attention: Q from x, fused packed KV from memory, both bf16
    ca = lp["cross_attn"]
    q = pallas_linear(x.reshape(B * T, E), ca["q_w"], ca["q_b"],
                      out_dtype=MXU_DTYPE).reshape(B, T, E)
    kv = pallas_linear(memory_bf.reshape(B * S, E), ca["kv_w"], ca["kv_b"],
                       out_dtype=MXU_DTYPE).reshape(B, S, 2 * E)
    x = pallas_cross_attention_block(q, kv, cross_pad, x,
                                     ca["out_w"], ca["out_b"],
                                     lp["norm2_g"], lp["norm2_b"], nhead)

    x = pallas_ffn(x.reshape(B * T, E), lp["lin1_w"], lp["lin1_b"],
                   lp["lin2_w"], lp["lin2_b"],
                   lp["norm3_g"], lp["norm3_b"]).reshape(B, T, E)
    return x


def text_decode_forward(params, memory, caracters, pos_text, text_mask,
                        text_padding_mask, memory_key_padding_mask, nhead):
    emb_tab = params["emb_table"]                               # (maxlen+1, E)
    E = emb_tab.shape[1]
    emb_scale = math.sqrt(E)

    embtext = jnp.take(emb_tab, pos_text, axis=0) * emb_scale   # (B, T, E)
    B, T = pos_text.shape
    # Faithful to the reference: PositionalEncoding indexes its buffer by dim 0
    # of the batch-first token embedding (i.e. the batch index).
    pe = params["pos_embedding"][:B]                            # (B, 1, E)
    # dropout layers are identity (eval mode)
    text = (embtext + pe) + jnp.take(emb_tab, caracters, axis=0) * emb_scale

    memory_bf = jnp.transpose(memory, (1, 0, 2))                # (B, S_mem, E), once
    neg_inf = jnp.float32(-jnp.inf)
    # small additive padding rows only; no dense (B,T,T) mask materialization
    tmask = text_mask.astype(jnp.float32)                       # (T, T)
    self_pad = jnp.where(text_padding_mask[:, None, :],
                         neg_inf, 0.0).astype(jnp.float32)      # (B, 1, T)
    cross_pad = jnp.where(memory_key_padding_mask[:, None, :],
                          neg_inf, 0.0).astype(jnp.float32)     # (B, 1, S_mem)

    x = text                                                    # batch-first (B, T, E)
    for lp in params["layers"]:
        x = decoder_layer_apply(x, memory_bf, lp, nhead, tmask, self_pad, cross_pad)
    # no final norm: TransformerDecoder was constructed without `norm`

    out = pallas_linear(x.reshape(B * T, E), params["gen_w"], params["gen_b"])
    out = out.reshape(B, T, -1)
    return jnp.transpose(out, (1, 0, 2))                        # (T, B, vocab)


# --------------------------- deterministic params ---------------------------

def _w(key, shape, scale=0.05):
    return scale * jax.random.normal(key, shape, dtype=jnp.float32)


def init_params(key, emb_size, nhead, num_layers, maxlen, vocab_size,
                dim_feedforward, pe_maxlen=64):
    """PyTorch-layout (out_features, in_features) float32 parameters."""
    keys = iter(jax.random.split(key, 8 + num_layers * 16))

    den = jnp.exp(-jnp.arange(0, emb_size, 2, dtype=jnp.float32)
                  * math.log(10000.0) / emb_size)
    pos = jnp.arange(pe_maxlen, dtype=jnp.float32).reshape(pe_maxlen, 1)
    pe = jnp.zeros((pe_maxlen, emb_size), dtype=jnp.float32)
    pe = pe.at[:, 0::2].set(jnp.sin(pos * den))
    pe = pe.at[:, 1::2].set(jnp.cos(pos * den))
    pos_embedding = pe[:, None, :]                              # (maxlen, 1, E)

    params = {
        "emb_table": jax.random.normal(next(keys), (maxlen + 1, emb_size),
                                       dtype=jnp.float32),
        "pos_embedding": pos_embedding,
        "gen_w": _w(next(keys), (vocab_size, emb_size)),
        "gen_b": _w(next(keys), (vocab_size,)),
        "layers": [],
    }
    for _ in range(num_layers):
        lp = {
            "self_attn": {
                "in_w": _w(next(keys), (3 * emb_size, emb_size)),
                "in_b": _w(next(keys), (3 * emb_size,)),
                "out_w": _w(next(keys), (emb_size, emb_size)),
                "out_b": _w(next(keys), (emb_size,)),
            },
            "cross_attn": {
                "in_w": _w(next(keys), (3 * emb_size, emb_size)),
                "in_b": _w(next(keys), (3 * emb_size,)),
                "out_w": _w(next(keys), (emb_size, emb_size)),
                "out_b": _w(next(keys), (emb_size,)),
            },
            "lin1_w": _w(next(keys), (dim_feedforward, emb_size)),
            "lin1_b": _w(next(keys), (dim_feedforward,)),
            "lin2_w": _w(next(keys), (emb_size, dim_feedforward)),
            "lin2_b": _w(next(keys), (emb_size,)),
            "norm1_g": jnp.ones((emb_size,), jnp.float32),
            "norm1_b": jnp.zeros((emb_size,), jnp.float32),
            "norm2_g": jnp.ones((emb_size,), jnp.float32),
            "norm2_b": jnp.zeros((emb_size,), jnp.float32),
            "norm3_g": jnp.ones((emb_size,), jnp.float32),
            "norm3_b": jnp.zeros((emb_size,), jnp.float32),
        }
        params["layers"].append(lp)
    return params


def prepare_params(p):
    """One-time conversion to kernel layout: matmul weights pre-transposed to
    (in, out) and cast to bf16 (MXU inputs); QKV packed for self-attn, KV packed
    for cross-attn.  Biases / LayerNorm params / embeddings stay float32."""
    E = p["emb_table"].shape[1]

    def t(w):
        return jnp.asarray(w).T.astype(MXU_DTYPE)

    out = {
        "emb_table": p["emb_table"],
        "pos_embedding": p["pos_embedding"],
        "gen_w": t(p["gen_w"]),                  # (E, vocab)
        "gen_b": p["gen_b"],
        "layers": [],
    }
    for lp in p["layers"]:
        sa, ca = lp["self_attn"], lp["cross_attn"]
        out["layers"].append({
            "self_attn": {
                "qkv_w": t(sa["in_w"]),          # (E, 3E) packed Q|K|V
                "qkv_b": sa["in_b"],
                "out_w": t(sa["out_w"]),         # (E, E)
                "out_b": sa["out_b"],
            },
            "cross_attn": {
                "q_w": t(ca["in_w"][:E]),        # (E, E)
                "q_b": ca["in_b"][:E],
                "kv_w": t(ca["in_w"][E:]),       # (E, 2E) packed K|V
                "kv_b": ca["in_b"][E:],
                "out_w": t(ca["out_w"]),
                "out_b": ca["out_b"],
            },
            "lin1_w": t(lp["lin1_w"]),           # (E, DFF)
            "lin1_b": lp["lin1_b"],
            "lin2_w": t(lp["lin2_w"]),           # (DFF, E)
            "lin2_b": lp["lin2_b"],
            "norm1_g": lp["norm1_g"], "norm1_b": lp["norm1_b"],
            "norm2_g": lp["norm2_g"], "norm2_b": lp["norm2_b"],
            "norm3_g": lp["norm3_g"], "norm3_b": lp["norm3_b"],
        })
    return out


# ----------------------------------- main -----------------------------------

if __name__ == "__main__":
    EMB, NHEAD, NLAYERS = 32, 4, 2
    MAXLEN, VOCAB, DFF = 20, 16, 64
    B, T, S_MEM = 2, 8, 10

    key = jax.random.PRNGKey(0)
    k_param, k_mem, k_tok1, k_tok2 = jax.random.split(key, 4)

    params = prepare_params(
        init_params(k_param, EMB, NHEAD, NLAYERS, MAXLEN, VOCAB, DFF))

    memory = jax.random.normal(k_mem, (S_MEM, B, EMB), dtype=jnp.float32)
    caracters = jax.random.randint(k_tok1, (B, T), 0, MAXLEN + 1, dtype=jnp.int32)
    pos_text = jax.random.randint(k_tok2, (B, T), 0, MAXLEN + 1, dtype=jnp.int32)

    # causal mask (like nn.Transformer.generate_square_subsequent_mask)
    text_mask = jnp.where(jnp.triu(jnp.ones((T, T), dtype=bool), k=1),
                          -jnp.inf, 0.0).astype(jnp.float32)
    text_padding_mask = jnp.zeros((B, T), dtype=bool).at[1, T - 1].set(True)
    memory_key_padding_mask = (jnp.zeros((B, S_MEM), dtype=bool)
                               .at[1, S_MEM - 2:].set(True))

    fwd = jax.jit(functools.partial(text_decode_forward, nhead=NHEAD))
    out = fwd(params, memory, caracters, pos_text, text_mask,
              text_padding_mask, memory_key_padding_mask)
    out = jax.block_until_ready(out)

    assert out.shape == (T, B, VOCAB), out.shape
    assert bool(jnp.all(jnp.isfinite(out)))
    print("KERNEL_OK")
</pallas_src>

<mosaic_0001>
module attributes {stable_mosaic.version = 11 : i64} {
  func.func @_linear_kernel_oneshot(%arg0: i32, %arg1: i32, %arg2: i32, %arg3: memref<16x32xf32, #tpu.memory_space<vmem>>, %arg4: memref<32x96xbf16, #tpu.memory_space<vmem>>, %arg5: memref<1x96xf32, #tpu.memory_space<vmem>>, %arg6: memref<16x96xbf16, #tpu.memory_space<vmem>>) attributes {dimension_semantics = [#tpu.dimension_semantics<parallel>, #tpu.dimension_semantics<parallel>, #tpu.dimension_semantics<arbitrary>], iteration_bounds = array<i64: 1, 1, 1>, scalar_prefetch = 0 : i64, scratch_operands = 0 : i64, tpu.core_type = #tpu.core_type<tc>, window_params = [{transform_indices = @transform_0, window_bounds = array<i64: 16, 32>}, {transform_indices = @transform_1, window_bounds = array<i64: 32, 96>}, {transform_indices = @transform_2, window_bounds = array<i64: 1, 96>}, {transform_indices = @transform_3, window_bounds = array<i64: 16, 96>}]} {
    %c0 = arith.constant 0 : index
    %c0_0 = arith.constant 0 : index
    %0 = vector.load %arg3[%c0, %c0_0] : memref<16x32xf32, #tpu.memory_space<vmem>>, vector<16x32xf32>
    %1 = arith.truncf %0 : vector<16x32xf32> to vector<16x32xbf16>
    %c0_1 = arith.constant 0 : index
    %c0_2 = arith.constant 0 : index
    %2 = vector.load %arg4[%c0_1, %c0_2] : memref<32x96xbf16, #tpu.memory_space<vmem>>, vector<32x96xbf16>
    %cst = arith.constant dense<0.000000e+00> : vector<16x96xf32>
    %3 = tpu.matmul %1, %2, %cst {dimension_numbers = #tpu.dot_dimension_numbers<[1], [0], [0], [1], [0, 0, 1, 1], [], []>} : vector<16x32xbf16>, vector<32x96xbf16>, vector<16x96xf32> -> vector<16x96xf32>
    %c0_3 = arith.constant 0 : index
    %c0_4 = arith.constant 0 : index
    %4 = vector.load %arg5[%c0_3, %c0_4] : memref<1x96xf32, #tpu.memory_space<vmem>>, vector<1x96xf32>
    %5 = vector.broadcast %4 : vector<1x96xf32> to vector<16x96xf32>
    %6 = arith.addf %3, %5 : vector<16x96xf32>
    %7 = arith.truncf %6 : vector<16x96xf32> to vector<16x96xbf16>
    %c0_5 = arith.constant 0 : index
    %c0_6 = arith.constant 0 : index
    %8 = vector.load %arg6[%c0_5, %c0_6] : memref<16x96xbf16, #tpu.memory_space<vmem>>, vector<16x96xbf16>
    tpu.vector_store %arg6[%c0_5, %c0_6], %7 {strides = array<i32>} : memref<16x96xbf16, #tpu.memory_space<vmem>>, vector<16x96xbf16>,
    return
  }
  func.func @transform_0(%arg0: i32, %arg1: i32, %arg2: i32) -> (i32, i32) {
    %c0_i32 = arith.constant 0 : i32
    return %arg0, %arg2 : i32, i32
  }
  func.func @transform_1(%arg0: i32, %arg1: i32, %arg2: i32) -> (i32, i32) {
    %c0_i32 = arith.constant 0 : i32
    return %arg2, %arg1 : i32, i32
  }
  func.func @transform_2(%arg0: i32, %arg1: i32, %arg2: i32) -> (i32, i32) {
    %c0_i32 = arith.constant 0 : i32
    %c0_i32_0 = arith.constant 0 : i32
    return %c0_i32, %arg1 : i32, i32
  }
  func.func @transform_3(%arg0: i32, %arg1: i32, %arg2: i32) -> (i32, i32) {
    %c0_i32 = arith.constant 0 : i32
    return %arg0, %arg1 : i32, i32
  }
}

module attributes {stable_mosaic.version = 11 : i64} {
  func.func @_linear_kernel_oneshot(%arg0: i32, %arg1: i32, %arg2: i32, %arg3: memref<16x32xf32, #tpu.memory_space<vmem>>, %arg4: memref<32x32xbf16, #tpu.memory_space<vmem>>, %arg5: memref<1x32xf32, #tpu.memory_space<vmem>>, %arg6: memref<16x32xbf16, #tpu.memory_space<vmem>>) attributes {dimension_semantics = [#tpu.dimension_semantics<parallel>, #tpu.dimension_semantics<parallel>, #tpu.dimension_semantics<arbitrary>], iteration_bounds = array<i64: 1, 1, 1>, scalar_prefetch = 0 : i64, scratch_operands = 0 : i64, tpu.core_type = #tpu.core_type<tc>, window_params = [{transform_indices = @transform_0, window_bounds = array<i64: 16, 32>}, {transform_indices = @transform_1, window_bounds = array<i64: 32, 32>}, {transform_indices = @transform_2, window_bounds = array<i64: 1, 32>}, {transform_indices = @transform_3, window_bounds = array<i64: 16, 32>}]} {
    %c0 = arith.constant 0 : index
    %c0_0 = arith.constant 0 : index
    %0 = vector.load %arg3[%c0, %c0_0] : memref<16x32xf32, #tpu.memory_space<vmem>>, vector<16x32xf32>
    %1 = arith.truncf %0 : vector<16x32xf32> to vector<16x32xbf16>
    %c0_1 = arith.constant 0 : index
    %c0_2 = arith.constant 0 : index
    %2 = vector.load %arg4[%c0_1, %c0_2] : memref<32x32xbf16, #tpu.memory_space<vmem>>, vector<32x32xbf16>
    %cst = arith.constant dense<0.000000e+00> : vector<16x32xf32>
    %3 = tpu.matmul %1, %2, %cst {dimension_numbers = #tpu.dot_dimension_numbers<[1], [0], [0], [1], [0, 0, 1, 1], [], []>} : vector<16x32xbf16>, vector<32x32xbf16>, vector<16x32xf32> -> vector<16x32xf32>
    %c0_3 = arith.constant 0 : index
    %c0_4 = arith.constant 0 : index
    %4 = vector.load %arg5[%c0_3, %c0_4] : memref<1x32xf32, #tpu.memory_space<vmem>>, vector<1x32xf32>
    %5 = vector.broadcast %4 : vector<1x32xf32> to vector<16x32xf32>
    %6 = arith.addf %3, %5 : vector<16x32xf32>
    %7 = arith.truncf %6 : vector<16x32xf32> to vector<16x32xbf16>
    %c0_5 = arith.constant 0 : index
    %c0_6 = arith.constant 0 : index
    %8 = vector.load %arg6[%c0_5, %c0_6] : memref<16x32xbf16, #tpu.memory_space<vmem>>, vector<16x32xbf16>
    tpu.vector_store %arg6[%c0_5, %c0_6], %7 {strides = array<i32>} : memref<16x32xbf16, #tpu.memory_space<vmem>>, vector<16x32xbf16>,
    return
  }
  func.func @transform_0(%arg0: i32, %arg1: i32, %arg2: i32) -> (i32, i32) {
    %c0_i32 = arith.constant 0 : i32
    return %arg0, %arg2 : i32, i32
  }
  func.func @transform_1(%arg0: i32, %arg1: i32, %arg2: i32) -> (i32, i32) {
    %c0_i32 = arith.constant 0 : i32
    return %arg2, %arg1 : i32, i32
  }
  func.func @transform_2(%arg0: i32, %arg1: i32, %arg2: i32) -> (i32, i32) {
    %c0_i32 = arith.constant 0 : i32
    %c0_i32_0 = arith.constant 0 : i32
    return %c0_i32, %arg1 : i32, i32
  }
  func.func @transform_3(%arg0: i32, %arg1: i32, %arg2: i32) -> (i32, i32) {
    %c0_i32 = arith.constant 0 : i32
    return %arg0, %arg1 : i32, i32
  }
}

module attributes {stable_mosaic.version = 11 : i64} {
  func.func @_linear_kernel_oneshot(%arg0: i32, %arg1: i32, %arg2: i32, %arg3: memref<20x32xf32, #tpu.memory_space<vmem>>, %arg4: memref<32x64xbf16, #tpu.memory_space<vmem>>, %arg5: memref<1x64xf32, #tpu.memory_space<vmem>>, %arg6: memref<20x64xbf16, #tpu.memory_space<vmem>>) attributes {dimension_semantics = [#tpu.dimension_semantics<parallel>, #tpu.dimension_semantics<parallel>, #tpu.dimension_semantics<arbitrary>], iteration_bounds = array<i64: 1, 1, 1>, scalar_prefetch = 0 : i64, scratch_operands = 0 : i64, tpu.core_type = #tpu.core_type<tc>, window_params = [{transform_indices = @transform_0, window_bounds = array<i64: 20, 32>}, {transform_indices = @transform_1, window_bounds = array<i64: 32, 64>}, {transform_indices = @transform_2, window_bounds = array<i64: 1, 64>}, {transform_indices = @transform_3, window_bounds = array<i64: 20, 64>}]} {
    %c0 = arith.constant 0 : index
    %c0_0 = arith.constant 0 : index
    %0 = vector.load %arg3[%c0, %c0_0] : memref<20x32xf32, #tpu.memory_space<vmem>>, vector<20x32xf32>
    %1 = arith.truncf %0 : vector<20x32xf32> to vector<20x32xbf16>
    %c0_1 = arith.constant 0 : index
    %c0_2 = arith.constant 0 : index
    %2 = vector.load %arg4[%c0_1, %c0_2] : memref<32x64xbf16, #tpu.memory_space<vmem>>, vector<32x64xbf16>
    %cst = arith.constant dense<0.000000e+00> : vector<20x64xf32>
    %3 = tpu.matmul %1, %2, %cst {dimension_numbers = #tpu.dot_dimension_numbers<[1], [0], [0], [1], [0, 0, 1, 1], [], []>} : vector<20x32xbf16>, vector<32x64xbf16>, vector<20x64xf32> -> vector<20x64xf32>
    %c0_3 = arith.constant 0 : index
    %c0_4 = arith.constant 0 : index
    %4 = vector.load %arg5[%c0_3, %c0_4] : memref<1x64xf32, #tpu.memory_space<vmem>>, vector<1x64xf32>
    %5 = vector.broadcast %4 : vector<1x64xf32> to vector<20x64xf32>
    %6 = arith.addf %3, %5 : vector<20x64xf32>
    %7 = arith.truncf %6 : vector<20x64xf32> to vector<20x64xbf16>
    %c0_5 = arith.constant 0 : index
    %c0_6 = arith.constant 0 : index
    %8 = vector.load %arg6[%c0_5, %c0_6] : memref<20x64xbf16, #tpu.memory_space<vmem>>, vector<20x64xbf16>
    tpu.vector_store %arg6[%c0_5, %c0_6], %7 {strides = array<i32>} : memref<20x64xbf16, #tpu.memory_space<vmem>>, vector<20x64xbf16>,
    return
  }
  func.func @transform_0(%arg0: i32, %arg1: i32, %arg2: i32) -> (i32, i32) {
    %c0_i32 = arith.constant 0 : i32
    return %arg0, %arg2 : i32, i32
  }
  func.func @transform_1(%arg0: i32, %arg1: i32, %arg2: i32) -> (i32, i32) {
    %c0_i32 = arith.constant 0 : i32
    return %arg2, %arg1 : i32, i32
  }
  func.func @transform_2(%arg0: i32, %arg1: i32, %arg2: i32) -> (i32, i32) {
    %c0_i32 = arith.constant 0 : i32
    %c0_i32_0 = arith.constant 0 : i32
    return %c0_i32, %arg1 : i32, i32
  }
  func.func @transform_3(%arg0: i32, %arg1: i32, %arg2: i32) -> (i32, i32) {
    %c0_i32 = arith.constant 0 : i32
    return %arg0, %arg1 : i32, i32
  }
}

module attributes {stable_mosaic.version = 11 : i64} {
  func.func @_attn_block_kernel(%arg0: i32, %arg1: memref<1x8x96xbf16, #tpu.memory_space<vmem>>, %arg2: memref<8x8xf32, #tpu.memory_space<vmem>>, %arg3: memref<1x1x8xf32, #tpu.memory_space<vmem>>, %arg4: memref<1x8x32xf32, #tpu.memory_space<vmem>>, %arg5: memref<32x32xbf16, #tpu.memory_space<vmem>>, %arg6: memref<1x32xf32, #tpu.memory_space<vmem>>, %arg7: memref<1x32xf32, #tpu.memory_space<vmem>>, %arg8: memref<1x32xf32, #tpu.memory_space<vmem>>, %arg9: memref<1x8x32xf32, #tpu.memory_space<vmem>>, %arg10: memref<8x32xf32, #tpu.memory_space<vmem>>) attributes {dimension_semantics = [#tpu.dimension_semantics<parallel>], iteration_bounds = array<i64: 2>, scalar_prefetch = 0 : i64, scratch_operands = 1 : i64, tpu.core_type = #tpu.core_type<tc>, window_params = [{transform_indices = @transform_0, window_bounds = array<i64: 1, 8, 96>}, {pipeline_mode = #tpu.pipeline_mode<synchronous>, transform_indices = @transform_1, window_bounds = array<i64: 8, 8>}, {transform_indices = @transform_2, window_bounds = array<i64: 1, 1, 8>}, {transform_indices = @transform_3, window_bounds = array<i64: 1, 8, 32>}, {pipeline_mode = #tpu.pipeline_mode<synchronous>, transform_indices = @transform_4, window_bounds = array<i64: 32, 32>}, {pipeline_mode = #tpu.pipeline_mode<synchronous>, transform_indices = @transform_5, window_bounds = array<i64: 1, 32>}, {pipeline_mode = #tpu.pipeline_mode<synchronous>, transform_indices = @transform_6, window_bounds = array<i64: 1, 32>}, {pipeline_mode = #tpu.pipeline_mode<synchronous>, transform_indices = @transform_7, window_bounds = array<i64: 1, 32>}, {transform_indices = @transform_8, window_bounds = array<i64: 1, 8, 32>}]} {
    %c0 = arith.constant 0 : index
    %c0_0 = arith.constant 0 : index
    %c0_1 = arith.constant 0 : index
    %0 = vector.load %arg1[%c0, %c0_0, %c0_1] : memref<1x8x96xbf16, #tpu.memory_space<vmem>>, vector<1x8x96xbf16>
    %1 = vector.shape_cast %0 : vector<1x8x96xbf16> to vector<8x96xbf16>
    %c0_2 = arith.constant 0 : index
    %c0_3 = arith.constant 0 : index
    %2 = vector.load %arg2[%c0_2, %c0_3] : memref<8x8xf32, #tpu.memory_space<vmem>>, vector<8x8xf32>
    %c0_4 = arith.constant 0 : index
    %c0_5 = arith.constant 0 : index
    %c0_6 = arith.constant 0 : index
    %3 = vector.load %arg3[%c0_4, %c0_5, %c0_6] : memref<1x1x8xf32, #tpu.memory_space<vmem>>, vector<1x1x8xf32>
    %4 = vector.shape_cast %3 : vector<1x1x8xf32> to vector<1x8xf32>
    %5 = vector.broadcast %4 : vector<1x8xf32> to vector<8x8xf32>
    %6 = arith.addf %2, %5 : vector<8x8xf32>
    %7 = vector.extract_strided_slice %1 {offsets = [0, 0], sizes = [8, 8], strides = [1, 1]} : vector<8x96xbf16> to vector<8x8xbf16>
    %8 = vector.extract_strided_slice %1 {offsets = [0, 32], sizes = [8, 8], strides = [1, 1]} : vector<8x96xbf16> to vector<8x8xbf16>
    %9 = vector.extract_strided_slice %1 {offsets = [0, 64], sizes = [8, 8], strides = [1, 1]} : vector<8x96xbf16> to vector<8x8xbf16>
    %cst = arith.constant dense<0.000000e+00> : vector<8x8xf32>
    %10 = tpu.matmul %7, %8, %cst {dimension_numbers = #tpu.dot_dimension_numbers<[1], [1], [0], [0], [0, 0, 1, 0], [], []>} : vector<8x8xbf16>, vector<8x8xbf16>, vector<8x8xf32> -> vector<8x8xf32>
    %cst_7 = arith.constant 0.353553385 : f32
    %11 = vector.broadcast %cst_7 : f32 to vector<8x8xf32>
    %12 = arith.mulf %10, %11 : vector<8x8xf32>
    %13 = arith.addf %12, %6 : vector<8x8xf32>
    %cst_8 = arith.constant dense<0xFF800000> : vector<8xf32>
    %14 = vector.multi_reduction <maximumf>, %13, %cst_8 [1] : vector<8x8xf32> to vector<8xf32>
    %15 = vector.shape_cast %14 : vector<8xf32> to vector<8x1xf32>
    %cst_9 = arith.constant -1.000000e+30 : f32
    %16 = vector.broadcast %cst_9 : f32 to vector<8x1xf32>
    %17 = arith.maximumf %15, %16 : vector<8x1xf32>
    %18 = vector.broadcast %17 : vector<8x1xf32> to vector<8x8xf32>
    %19 = arith.subf %13, %18 : vector<8x8xf32>
    %20 = math.exp %19 : vector<8x8xf32>
    %cst_10 = arith.constant dense<0.000000e+00> : vector<8xf32>
    %21 = vector.multi_reduction <add>, %20, %cst_10 [1] : vector<8x8xf32> to vector<8xf32>
    %22 = vector.shape_cast %21 : vector<8xf32> to vector<8x1xf32>
    %cst_11 = arith.constant 1.000000e-30 : f32
    %23 = vector.broadcast %cst_11 : f32 to vector<8x1xf32>
    %24 = arith.maximumf %22, %23 : vector<8x1xf32>
    %25 = tpu.reciprocal %24 {approx = true} : vector<8x1xf32> -> vector<8x1xf32>
    %26 = vector.broadcast %25 : vector<8x1xf32> to vector<8x8xf32>
    %27 = arith.mulf %20, %26 : vector<8x8xf32>
    %28 = arith.truncf %27 : vector<8x8xf32> to vector<8x8xbf16>
    %cst_12 = arith.constant dense<0.000000e+00> : vector<8x8xf32>
    %29 = tpu.matmul %28, %9, %cst_12 {dimension_numbers = #tpu.dot_dimension_numbers<[1], [0], [0], [1], [0, 0, 1, 1], [], []>} : vector<8x8xbf16>, vector<8x8xbf16>, vector<8x8xf32> -> vector<8x8xf32>
    %c0_13 = arith.constant 0 : index
    %c0_14 = arith.constant 0 : index
    %30 = vector.load %arg10[%c0_13, %c0_14] : memref<8x32xf32, #tpu.memory_space<vmem>>, vector<8x8xf32>
    tpu.vector_store %arg10[%c0_13, %c0_14], %29 {strides = array<i32>} : memref<8x32xf32, #tpu.memory_space<vmem>>, vector<8x8xf32>,
    %31 = vector.extract_strided_slice %1 {offsets = [0, 8], sizes = [8, 8], strides = [1, 1]} : vector<8x96xbf16> to vector<8x8xbf16>
    %32 = vector.extract_strided_slice %1 {offsets = [0, 40], sizes = [8, 8], strides = [1, 1]} : vector<8x96xbf16> to vector<8x8xbf16>
    %33 = vector.extract_strided_slice %1 {offsets = [0, 72], sizes = [8, 8], strides = [1, 1]} : vector<8x96xbf16> to vector<8x8xbf16>
    %cst_15 = arith.constant dense<0.000000e+00> : vector<8x8xf32>
    %34 = tpu.matmul %31, %32, %cst_15 {dimension_numbers = #tpu.dot_dimension_numbers<[1], [1], [0], [0], [0, 0, 1, 0], [], []>} : vector<8x8xbf16>, vector<8x8xbf16>, vector<8x8xf32> -> vector<8x8xf32>
    %cst_16 = arith.constant 0.353553385 : f32
    %35 = vector.broadcast %cst_16 : f32 to vector<8x8xf32>
    %36 = arith.mulf %34, %35 : vector<8x8xf32>
    %37 = arith.addf %36, %6 : vector<8x8xf32>
    %cst_17 = arith.constant dense<0xFF800000> : vector<8xf32>
    %38 = vector.multi_reduction <maximumf>, %37, %cst_17 [1] : vector<8x8xf32> to vector<8xf32>
    %39 = vector.shape_cast %38 : vector<8xf32> to vector<8x1xf32>
    %cst_18 = arith.constant -1.000000e+30 : f32
    %40 = vector.broadcast %cst_18 : f32 to vector<8x1xf32>
    %41 = arith.maximumf %39, %40 : vector<8x1xf32>
    %42 = vector.broadcast %41 : vector<8x1xf32> to vector<8x8xf32>
    %43 = arith.subf %37, %42 : vector<8x8xf32>
    %44 = math.exp %43 : vector<8x8xf32>
    %cst_19 = arith.constant dense<0.000000e+00> : vector<8xf32>
    %45 = vector.multi_reduction <add>, %44, %cst_19 [1] : vector<8x8xf32> to vector<8xf32>
    %46 = vector.shape_cast %45 : vector<8xf32> to vector<8x1xf32>
    %cst_20 = arith.constant 1.000000e-30 : f32
    %47 = vector.broadcast %cst_20 : f32 to vector<8x1xf32>
    %48 = arith.maximumf %46, %47 : vector<8x1xf32>
    %49 = tpu.reciprocal %48 {approx = true} : vector<8x1xf32> -> vector<8x1xf32>
    %50 = vector.broadcast %49 : vector<8x1xf32> to vector<8x8xf32>
    %51 = arith.mulf %44, %50 : vector<8x8xf32>
    %52 = arith.truncf %51 : vector<8x8xf32> to vector<8x8xbf16>
    %cst_21 = arith.constant dense<0.000000e+00> : vector<8x8xf32>
    %53 = tpu.matmul %52, %33, %cst_21 {dimension_numbers = #tpu.dot_dimension_numbers<[1], [0], [0], [1], [0, 0, 1, 1], [], []>} : vector<8x8xbf16>, vector<8x8xbf16>, vector<8x8xf32> -> vector<8x8xf32>
    %c0_22 = arith.constant 0 : index
    %c8 = arith.constant 8 : index
    %54 = vector.load %arg10[%c0_22, %c8] : memref<8x32xf32, #tpu.memory_space<vmem>>, vector<8x8xf32>
    tpu.vector_store %arg10[%c0_22, %c8], %53 {strides = array<i32>} : memref<8x32xf32, #tpu.memory_space<vmem>>, vector<8x8xf32>,
    %55 = vector.extract_strided_slice %1 {offsets = [0, 16], sizes = [8, 8], strides = [1, 1]} : vector<8x96xbf16> to vector<8x8xbf16>
    %56 = vector.extract_strided_slice %1 {offsets = [0, 48], sizes = [8, 8], strides = [1, 1]} : vector<8x96xbf16> to vector<8x8xbf16>
    %57 = vector.extract_strided_slice %1 {offsets = [0, 80], sizes = [8, 8], strides = [1, 1]} : vector<8x96xbf16> to vector<8x8xbf16>
    %cst_23 = arith.constant dense<0.000000e+00> : vector<8x8xf32>
    %58 = tpu.matmul %55, %56, %cst_23 {dimension_numbers = #tpu.dot_dimension_numbers<[1], [1], [0], [0], [0, 0, 1, 0], [], []>} : vector<8x8xbf16>, vector<8x8xbf16>, vector<8x8xf32> -> vector<8x8xf32>
    %cst_24 = arith.constant 0.353553385 : f32
    %59 = vector.broadcast %cst_24 : f32 to vector<8x8xf32>
    %60 = arith.mulf %58, %59 : vector<8x8xf32>
    %61 = arith.addf %60, %6 : vector<8x8xf32>
    %cst_25 = arith.constant dense<0xFF800000> : vector<8xf32>
    %62 = vector.multi_reduction <maximumf>, %61, %cst_25 [1] : vector<8x8xf32> to vector<8xf32>
    %63 = vector.shape_cast %62 : vector<8xf32> to vector<8x1xf32>
    %cst_26 = arith.constant -1.000000e+30 : f32
    %64 = vector.broadcast %cst_26 : f32 to vector<8x1xf32>
    %65 = arith.maximumf %63, %64 : vector<8x1xf32>
    %66 = vector.broadcast %65 : vector<8x1xf32> to vector<8x8xf32>
    %67 = arith.subf %61, %66 : vector<8x8xf32>
    %68 = math.exp %67 : vector<8x8xf32>
    %cst_27 = arith.constant dense<0.000000e+00> : vector<8xf32>
    %69 = vector.multi_reduction <add>, %68, %cst_27 [1] : vector<8x8xf32> to vector<8xf32>
    %70 = vector.shape_cast %69 : vector<8xf32> to vector<8x1xf32>
    %cst_28 = arith.constant 1.000000e-30 : f32
    %71 = vector.broadcast %cst_28 : f32 to vector<8x1xf32>
    %72 = arith.maximumf %70, %71 : vector<8x1xf32>
    %73 = tpu.reciprocal %72 {approx = true} : vector<8x1xf32> -> vector<8x1xf32>
    %74 = vector.broadcast %73 : vector<8x1xf32> to vector<8x8xf32>
    %75 = arith.mulf %68, %74 : vector<8x8xf32>
    %76 = arith.truncf %75 : vector<8x8xf32> to vector<8x8xbf16>
    %cst_29 = arith.constant dense<0.000000e+00> : vector<8x8xf32>
    %77 = tpu.matmul %76, %57, %cst_29 {dimension_numbers = #tpu.dot_dimension_numbers<[1], [0], [0], [1], [0, 0, 1, 1], [], []>} : vector<8x8xbf16>, vector<8x8xbf16>, vector<8x8xf32> -> vector<8x8xf32>
    %c0_30 = arith.constant 0 : index
    %c16 = arith.constant 16 : index
    %78 = vector.load %arg10[%c0_30, %c16] : memref<8x32xf32, #tpu.memory_space<vmem>>, vector<8x8xf32>
    tpu.vector_store %arg10[%c0_30, %c16], %77 {strides = array<i32>} : memref<8x32xf32, #tpu.memory_space<vmem>>, vector<8x8xf32>,
    %79 = vector.extract_strided_slice %1 {offsets = [0, 24], sizes = [8, 8], strides = [1, 1]} : vector<8x96xbf16> to vector<8x8xbf16>
    %80 = vector.extract_strided_slice %1 {offsets = [0, 56], sizes = [8, 8], strides = [1, 1]} : vector<8x96xbf16> to vector<8x8xbf16>
    %81 = vector.extract_strided_slice %1 {offsets = [0, 88], sizes = [8, 8], strides = [1, 1]} : vector<8x96xbf16> to vector<8x8xbf16>
    %cst_31 = arith.constant dense<0.000000e+00> : vector<8x8xf32>
    %82 = tpu.matmul %79, %80, %cst_31 {dimension_numbers = #tpu.dot_dimension_numbers<[1], [1], [0], [0], [0, 0, 1, 0], [], []>} : vector<8x8xbf16>, vector<8x8xbf16>, vector<8x8xf32> -> vector<8x8xf32>
    %cst_32 = arith.constant 0.353553385 : f32
    %83 = vector.broadcast %cst_32 : f32 to vector<8x8xf32>
    %84 = arith.mulf %82, %83 : vector<8x8xf32>
    %85 = arith.addf %84, %6 : vector<8x8xf32>
    %cst_33 = arith.constant dense<0xFF800000> : vector<8xf32>
    %86 = vector.multi_reduction <maximumf>, %85, %cst_33 [1] : vector<8x8xf32> to vector<8xf32>
    %87 = vector.shape_cast %86 : vector<8xf32> to vector<8x1xf32>
    %cst_34 = arith.constant -1.000000e+30 : f32
    %88 = vector.broadcast %cst_34 : f32 to vector<8x1xf32>
    %89 = arith.maximumf %87, %88 : vector<8x1xf32>
    %90 = vector.broadcast %89 : vector<8x1xf32> to vector<8x8xf32>
    %91 = arith.subf %85, %90 : vector<8x8xf32>
    %92 = math.exp %91 : vector<8x8xf32>
    %cst_35 = arith.constant dense<0.000000e+00> : vector<8xf32>
    %93 = vector.multi_reduction <add>, %92, %cst_35 [1] : vector<8x8xf32> to vector<8xf32>
    %94 = vector.shape_cast %93 : vector<8xf32> to vector<8x1xf32>
    %cst_36 = arith.constant 1.000000e-30 : f32
    %95 = vector.broadcast %cst_36 : f32 to vector<8x1xf32>
    %96 = arith.maximumf %94, %95 : vector<8x1xf32>
    %97 = tpu.reciprocal %96 {approx = true} : vector<8x1xf32> -> vector<8x1xf32>
    %98 = vector.broadcast %97 : vector<8x1xf32> to vector<8x8xf32>
    %99 = arith.mulf %92, %98 : vector<8x8xf32>
    %100 = arith.truncf %99 : vector<8x8xf32> to vector<8x8xbf16>
    %cst_37 = arith.constant dense<0.000000e+00> : vector<8x8xf32>
    %101 = tpu.matmul %100, %81, %cst_37 {dimension_numbers = #tpu.dot_dimension_numbers<[1], [0], [0], [1], [0, 0, 1, 1], [], []>} : vector<8x8xbf16>, vector<8x8xbf16>, vector<8x8xf32> -> vector<8x8xf32>
    %c0_38 = arith.constant 0 : index
    %c24 = arith.constant 24 : index
    %102 = vector.load %arg10[%c0_38, %c24] : memref<8x32xf32, #tpu.memory_space<vmem>>, vector<8x8xf32>
    tpu.vector_store %arg10[%c0_38, %c24], %101 {strides = array<i32>} : memref<8x32xf32, #tpu.memory_space<vmem>>, vector<8x8xf32>,
    %c0_39 = arith.constant 0 : index
    %c0_40 = arith.constant 0 : index
    %103 = vector.load %arg10[%c0_39, %c0_40] : memref<8x32xf32, #tpu.memory_space<vmem>>, vector<8x32xf32>
    %104 = arith.truncf %103 : vector<8x32xf32> to vector<8x32xbf16>
    %c0_41 = arith.constant 0 : index
    %c0_42 = arith.constant 0 : index
    %105 = vector.load %arg5[%c0_41, %c0_42] : memref<32x32xbf16, #tpu.memory_space<vmem>>, vector<32x32xbf16>
    %cst_43 = arith.constant dense<0.000000e+00> : vector<8x32xf32>
    %106 = tpu.matmul %104, %105, %cst_43 {dimension_numbers = #tpu.dot_dimension_numbers<[1], [0], [0], [1], [0, 0, 1, 1], [], []>} : vector<8x32xbf16>, vector<32x32xbf16>, vector<8x32xf32> -> vector<8x32xf32>
    %c0_44 = arith.constant 0 : index
    %c0_45 = arith.constant 0 : index
    %107 = vector.load %arg6[%c0_44, %c0_45] : memref<1x32xf32, #tpu.memory_space<vmem>>, vector<1x32xf32>
    %108 = vector.broadcast %107 : vector<1x32xf32> to vector<8x32xf32>
    %109 = arith.addf %106, %108 : vector<8x32xf32>
    %c0_46 = arith.constant 0 : index
    %c0_47 = arith.constant 0 : index
    %c0_48 = arith.constant 0 : index
    %110 = vector.load %arg4[%c0_46, %c0_47, %c0_48] : memref<1x8x32xf32, #tpu.memory_space<vmem>>, vector<1x8x32xf32>
    %111 = vector.shape_cast %110 : vector<1x8x32xf32> to vector<8x32xf32>
    %112 = arith.addf %109, %111 : vector<8x32xf32>
    %cst_49 = arith.constant dense<0.000000e+00> : vector<8xf32>
    %113 = vector.multi_reduction <add>, %112, %cst_49 [1] : vector<8x32xf32> to vector<8xf32>
    %114 = vector.shape_cast %113 : vector<8xf32> to vector<8x1xf32>
    %cst_50 = arith.constant 3.200000e+01 : f32
    %115 = vector.broadcast %cst_50 : f32 to vector<8x1xf32>
    %116 = arith.divf %114, %115 : vector<8x1xf32>
    %117 = vector.broadcast %116 : vector<8x1xf32> to vector<8x32xf32>
    %118 = arith.subf %112, %117 : vector<8x32xf32>
    %119 = arith.mulf %118, %118 : vector<8x32xf32>
    %cst_51 = arith.constant dense<0.000000e+00> : vector<8xf32>
    %120 = vector.multi_reduction <add>, %119, %cst_51 [1] : vector<8x32xf32> to vector<8xf32>
    %121 = vector.shape_cast %120 : vector<8xf32> to vector<8x1xf32>
    %cst_52 = arith.constant 3.200000e+01 : f32
    %122 = vector.broadcast %cst_52 : f32 to vector<8x1xf32>
    %123 = arith.divf %121, %122 : vector<8x1xf32>
    %cst_53 = arith.constant 9.99999974E-6 : f32
    %124 = vector.broadcast %cst_53 : f32 to vector<8x1xf32>
    %125 = arith.addf %123, %124 : vector<8x1xf32>
    %126 = math.rsqrt %125 : vector<8x1xf32>
    %127 = vector.broadcast %126 : vector<8x1xf32> to vector<8x32xf32>
    %128 = arith.mulf %118, %127 : vector<8x32xf32>
    %c0_54 = arith.constant 0 : index
    %c0_55 = arith.constant 0 : index
    %129 = vector.load %arg7[%c0_54, %c0_55] : memref<1x32xf32, #tpu.memory_space<vmem>>, vector<1x32xf32>
    %130 = vector.broadcast %129 : vector<1x32xf32> to vector<8x32xf32>
    %131 = arith.mulf %128, %130 : vector<8x32xf32>
    %c0_56 = arith.constant 0 : index
    %c0_57 = arith.constant 0 : index
    %132 = vector.load %arg8[%c0_56, %c0_57] : memref<1x32xf32, #tpu.memory_space<vmem>>, vector<1x32xf32>
    %133 = vector.broadcast %132 : vector<1x32xf32> to vector<8x32xf32>
    %134 = arith.addf %131, %133 : vector<8x32xf32>
    %c0_58 = arith.constant 0 : index
    %c0_59 = arith.constant 0 : index
    %c0_60 = arith.constant 0 : index
    %135 = vector.load %arg9[%c0_58, %c0_59, %c0_60] : memref<1x8x32xf32, #tpu.memory_space<vmem>>, vector<1x8x32xf32>
    %136 = vector.shape_cast %135 : vector<1x8x32xf32> to vector<8x32xf32>
    %137 = vector.shape_cast %134 : vector<8x32xf32> to vector<1x8x32xf32>
    tpu.vector_store %arg9[%c0_58, %c0_59, %c0_60], %137 {strides = array<i32>} : memref<1x8x32xf32, #tpu.memory_space<vmem>>, vector<1x8x32xf32>,
    return
  }
  func.func @transform_0(%arg0: i32) -> (i32, i32, i32) {
    %c0_i32 = arith.constant 0 : i32
    %c0_i32_0 = arith.constant 0 : i32
    %c0_i32_1 = arith.constant 0 : i32
    return %arg0, %c0_i32, %c0_i32_0 : i32, i32, i32
  }
  func.func @transform_1(%arg0: i32) -> (i32, i32) {
    %c0_i32 = arith.constant 0 : i32
    %c0_i32_0 = arith.constant 0 : i32
    %c0_i32_1 = arith.constant 0 : i32
    return %c0_i32, %c0_i32_0 : i32, i32
  }
  func.func @transform_2(%arg0: i32) -> (i32, i32, i32) {
    %c0_i32 = arith.constant 0 : i32
    %c0_i32_0 = arith.constant 0 : i32
    %c0_i32_1 = arith.constant 0 : i32
    return %arg0, %c0_i32, %c0_i32_0 : i32, i32, i32
  }
  func.func @transform_3(%arg0: i32) -> (i32, i32, i32) {
    %c0_i32 = arith.constant 0 : i32
    %c0_i32_0 = arith.constant 0 : i32
    %c0_i32_1 = arith.constant 0 : i32
    return %arg0, %c0_i32, %c0_i32_0 : i32, i32, i32
  }
  func.func @transform_4(%arg0: i32) -> (i32, i32) {
    %c0_i32 = arith.constant 0 : i32
    %c0_i32_0 = arith.constant 0 : i32
    %c0_i32_1 = arith.constant 0 : i32
    return %c0_i32, %c0_i32_0 : i32, i32
  }
  func.func @transform_5(%arg0: i32) -> (i32, i32) {
    %c0_i32 = arith.constant 0 : i32
    %c0_i32_0 = arith.constant 0 : i32
    %c0_i32_1 = arith.constant 0 : i32
    return %c0_i32, %c0_i32_0 : i32, i32
  }
  func.func @transform_6(%arg0: i32) -> (i32, i32) {
    %c0_i32 = arith.constant 0 : i32
    %c0_i32_0 = arith.constant 0 : i32
    %c0_i32_1 = arith.constant 0 : i32
    return %c0_i32, %c0_i32_0 : i32, i32
  }
  func.func @transform_7(%arg0: i32) -> (i32, i32) {
    %c0_i32 = arith.constant 0 : i32
    %c0_i32_0 = arith.constant 0 : i32
    %c0_i32_1 = arith.constant 0 : i32
    return %c0_i32, %c0_i32_0 : i32, i32
  }
  func.func @transform_8(%arg0: i32) -> (i32, i32, i32) {
    %c0_i32 = arith.constant 0 : i32
    %c0_i32_0 = arith.constant 0 : i32
    %c0_i32_1 = arith.constant 0 : i32
    return %arg0, %c0_i32, %c0_i32_0 : i32, i32, i32
  }
}

module attributes {stable_mosaic.version = 11 : i64} {
  func.func @_attn_block_kernel(%arg0: i32, %arg1: memref<1x8x32xbf16, #tpu.memory_space<vmem>>, %arg2: memref<1x10x64xbf16, #tpu.memory_space<vmem>>, %arg3: memref<1x1x10xf32, #tpu.memory_space<vmem>>, %arg4: memref<1x8x32xf32, #tpu.memory_space<vmem>>, %arg5: memref<32x32xbf16, #tpu.memory_space<vmem>>, %arg6: memref<1x32xf32, #tpu.memory_space<vmem>>, %arg7: memref<1x32xf32, #tpu.memory_space<vmem>>, %arg8: memref<1x32xf32, #tpu.memory_space<vmem>>, %arg9: memref<1x8x32xf32, #tpu.memory_space<vmem>>, %arg10: memref<8x32xf32, #tpu.memory_space<vmem>>) attributes {dimension_semantics = [#tpu.dimension_semantics<parallel>], iteration_bounds = array<i64: 2>, scalar_prefetch = 0 : i64, scratch_operands = 1 : i64, tpu.core_type = #tpu.core_type<tc>, window_params = [{transform_indices = @transform_0, window_bounds = array<i64: 1, 8, 32>}, {transform_indices = @transform_1, window_bounds = array<i64: 1, 10, 64>}, {transform_indices = @transform_2, window_bounds = array<i64: 1, 1, 10>}, {transform_indices = @transform_3, window_bounds = array<i64: 1, 8, 32>}, {pipeline_mode = #tpu.pipeline_mode<synchronous>, transform_indices = @transform_4, window_bounds = array<i64: 32, 32>}, {pipeline_mode = #tpu.pipeline_mode<synchronous>, transform_indices = @transform_5, window_bounds = array<i64: 1, 32>}, {pipeline_mode = #tpu.pipeline_mode<synchronous>, transform_indices = @transform_6, window_bounds = array<i64: 1, 32>}, {pipeline_mode = #tpu.pipeline_mode<synchronous>, transform_indices = @transform_7, window_bounds = array<i64: 1, 32>}, {transform_indices = @transform_8, window_bounds = array<i64: 1, 8, 32>}]} {
    %c0 = arith.constant 0 : index
    %c0_0 = arith.constant 0 : index
    %c0_1 = arith.constant 0 : index
    %0 = vector.load %arg1[%c0, %c0_0, %c0_1] : memref<1x8x32xbf16, #tpu.memory_space<vmem>>, vector<1x8x32xbf16>
    %1 = vector.shape_cast %0 : vector<1x8x32xbf16> to vector<8x32xbf16>
    %c0_2 = arith.constant 0 : index
    %c0_3 = arith.constant 0 : index
    %c0_4 = arith.constant 0 : index
    %2 = vector.load %arg2[%c0_2, %c0_3, %c0_4] : memref<1x10x64xbf16, #tpu.memory_space<vmem>>, vector<1x10x64xbf16>
    %3 = vector.shape_cast %2 : vector<1x10x64xbf16> to vector<10x64xbf16>
    %c0_5 = arith.constant 0 : index
    %c0_6 = arith.constant 0 : index
    %c0_7 = arith.constant 0 : index
    %4 = vector.load %arg3[%c0_5, %c0_6, %c0_7] : memref<1x1x10xf32, #tpu.memory_space<vmem>>, vector<1x1x10xf32>
    %5 = vector.shape_cast %4 : vector<1x1x10xf32> to vector<1x10xf32>
    %6 = vector.extract_strided_slice %1 {offsets = [0, 0], sizes = [8, 8], strides = [1, 1]} : vector<8x32xbf16> to vector<8x8xbf16>
    %7 = vector.extract_strided_slice %3 {offsets = [0, 0], sizes = [10, 8], strides = [1, 1]} : vector<10x64xbf16> to vector<10x8xbf16>
    %8 = vector.extract_strided_slice %3 {offsets = [0, 32], sizes = [10, 8], strides = [1, 1]} : vector<10x64xbf16> to vector<10x8xbf16>
    %cst = arith.constant dense<0.000000e+00> : vector<8x10xf32>
    %9 = tpu.matmul %6, %7, %cst {dimension_numbers = #tpu.dot_dimension_numbers<[1], [1], [0], [0], [0, 0, 1, 0], [], []>} : vector<8x8xbf16>, vector<10x8xbf16>, vector<8x10xf32> -> vector<8x10xf32>
    %cst_8 = arith.constant 0.353553385 : f32
    %10 = vector.broadcast %cst_8 : f32 to vector<8x10xf32>
    %11 = arith.mulf %9, %10 : vector<8x10xf32>
    %12 = vector.broadcast %5 : vector<1x10xf32> to vector<8x10xf32>
    %13 = arith.addf %11, %12 : vector<8x10xf32>
    %cst_9 = arith.constant dense<0xFF800000> : vector<8xf32>
    %14 = vector.multi_reduction <maximumf>, %13, %cst_9 [1] : vector<8x10xf32> to vector<8xf32>
    %15 = vector.shape_cast %14 : vector<8xf32> to vector<8x1xf32>
    %cst_10 = arith.constant -1.000000e+30 : f32
    %16 = vector.broadcast %cst_10 : f32 to vector<8x1xf32>
    %17 = arith.maximumf %15, %16 : vector<8x1xf32>
    %18 = vector.broadcast %17 : vector<8x1xf32> to vector<8x10xf32>
    %19 = arith.subf %13, %18 : vector<8x10xf32>
    %20 = math.exp %19 : vector<8x10xf32>
    %cst_11 = arith.constant dense<0.000000e+00> : vector<8xf32>
    %21 = vector.multi_reduction <add>, %20, %cst_11 [1] : vector<8x10xf32> to vector<8xf32>
    %22 = vector.shape_cast %21 : vector<8xf32> to vector<8x1xf32>
    %cst_12 = arith.constant 1.000000e-30 : f32
    %23 = vector.broadcast %cst_12 : f32 to vector<8x1xf32>
    %24 = arith.maximumf %22, %23 : vector<8x1xf32>
    %25 = tpu.reciprocal %24 {approx = true} : vector<8x1xf32> -> vector<8x1xf32>
    %26 = vector.broadcast %25 : vector<8x1xf32> to vector<8x10xf32>
    %27 = arith.mulf %20, %26 : vector<8x10xf32>
    %28 = arith.truncf %27 : vector<8x10xf32> to vector<8x10xbf16>
    %cst_13 = arith.constant dense<0.000000e+00> : vector<8x8xf32>
    %29 = tpu.matmul %28, %8, %cst_13 {dimension_numbers = #tpu.dot_dimension_numbers<[1], [0], [0], [1], [0, 0, 1, 1], [], []>} : vector<8x10xbf16>, vector<10x8xbf16>, vector<8x8xf32> -> vector<8x8xf32>
    %c0_14 = arith.constant 0 : index
    %c0_15 = arith.constant 0 : index
    %30 = vector.load %arg10[%c0_14, %c0_15] : memref<8x32xf32, #tpu.memory_space<vmem>>, vector<8x8xf32>
    tpu.vector_store %arg10[%c0_14, %c0_15], %29 {strides = array<i32>} : memref<8x32xf32, #tpu.memory_space<vmem>>, vector<8x8xf32>,
    %31 = vector.extract_strided_slice %1 {offsets = [0, 8], sizes = [8, 8], strides = [1, 1]} : vector<8x32xbf16> to vector<8x8xbf16>
    %32 = vector.extract_strided_slice %3 {offsets = [0, 8], sizes = [10, 8], strides = [1, 1]} : vector<10x64xbf16> to vector<10x8xbf16>
    %33 = vector.extract_strided_slice %3 {offsets = [0, 40], sizes = [10, 8], strides = [1, 1]} : vector<10x64xbf16> to vector<10x8xbf16>
    %cst_16 = arith.constant dense<0.000000e+00> : vector<8x10xf32>
    %34 = tpu.matmul %31, %32, %cst_16 {dimension_numbers = #tpu.dot_dimension_numbers<[1], [1], [0], [0], [0, 0, 1, 0], [], []>} : vector<8x8xbf16>, vector<10x8xbf16>, vector<8x10xf32> -> vector<8x10xf32>
    %cst_17 = arith.constant 0.353553385 : f32
    %35 = vector.broadcast %cst_17 : f32 to vector<8x10xf32>
    %36 = arith.mulf %34, %35 : vector<8x10xf32>
    %37 = vector.broadcast %5 : vector<1x10xf32> to vector<8x10xf32>
    %38 = arith.addf %36, %37 : vector<8x10xf32>
    %cst_18 = arith.constant dense<0xFF800000> : vector<8xf32>
    %39 = vector.multi_reduction <maximumf>, %38, %cst_18 [1] : vector<8x10xf32> to vector<8xf32>
    %40 = vector.shape_cast %39 : vector<8xf32> to vector<8x1xf32>
    %cst_19 = arith.constant -1.000000e+30 : f32
    %41 = vector.broadcast %cst_19 : f32 to vector<8x1xf32>
    %42 = arith.maximumf %40, %41 : vector<8x1xf32>
    %43 = vector.broadcast %42 : vector<8x1xf32> to vector<8x10xf32>
    %44 = arith.subf %38, %43 : vector<8x10xf32>
    %45 = math.exp %44 : vector<8x10xf32>
    %cst_20 = arith.constant dense<0.000000e+00> : vector<8xf32>
    %46 = vector.multi_reduction <add>, %45, %cst_20 [1] : vector<8x10xf32> to vector<8xf32>
    %47 = vector.shape_cast %46 : vector<8xf32> to vector<8x1xf32>
    %cst_21 = arith.constant 1.000000e-30 : f32
    %48 = vector.broadcast %cst_21 : f32 to vector<8x1xf32>
    %49 = arith.maximumf %47, %48 : vector<8x1xf32>
    %50 = tpu.reciprocal %49 {approx = true} : vector<8x1xf32> -> vector<8x1xf32>
    %51 = vector.broadcast %50 : vector<8x1xf32> to vector<8x10xf32>
    %52 = arith.mulf %45, %51 : vector<8x10xf32>
    %53 = arith.truncf %52 : vector<8x10xf32> to vector<8x10xbf16>
    %cst_22 = arith.constant dense<0.000000e+00> : vector<8x8xf32>
    %54 = tpu.matmul %53, %33, %cst_22 {dimension_numbers = #tpu.dot_dimension_numbers<[1], [0], [0], [1], [0, 0, 1, 1], [], []>} : vector<8x10xbf16>, vector<10x8xbf16>, vector<8x8xf32> -> vector<8x8xf32>
    %c0_23 = arith.constant 0 : index
    %c8 = arith.constant 8 : index
    %55 = vector.load %arg10[%c0_23, %c8] : memref<8x32xf32, #tpu.memory_space<vmem>>, vector<8x8xf32>
    tpu.vector_store %arg10[%c0_23, %c8], %54 {strides = array<i32>} : memref<8x32xf32, #tpu.memory_space<vmem>>, vector<8x8xf32>,
    %56 = vector.extract_strided_slice %1 {offsets = [0, 16], sizes = [8, 8], strides = [1, 1]} : vector<8x32xbf16> to vector<8x8xbf16>
    %57 = vector.extract_strided_slice %3 {offsets = [0, 16], sizes = [10, 8], strides = [1, 1]} : vector<10x64xbf16> to vector<10x8xbf16>
    %58 = vector.extract_strided_slice %3 {offsets = [0, 48], sizes = [10, 8], strides = [1, 1]} : vector<10x64xbf16> to vector<10x8xbf16>
    %cst_24 = arith.constant dense<0.000000e+00> : vector<8x10xf32>
    %59 = tpu.matmul %56, %57, %cst_24 {dimension_numbers = #tpu.dot_dimension_numbers<[1], [1], [0], [0], [0, 0, 1, 0], [], []>} : vector<8x8xbf16>, vector<10x8xbf16>, vector<8x10xf32> -> vector<8x10xf32>
    %cst_25 = arith.constant 0.353553385 : f32
    %60 = vector.broadcast %cst_25 : f32 to vector<8x10xf32>
    %61 = arith.mulf %59, %60 : vector<8x10xf32>
    %62 = vector.broadcast %5 : vector<1x10xf32> to vector<8x10xf32>
    %63 = arith.addf %61, %62 : vector<8x10xf32>
    %cst_26 = arith.constant dense<0xFF800000> : vector<8xf32>
    %64 = vector.multi_reduction <maximumf>, %63, %cst_26 [1] : vector<8x10xf32> to vector<8xf32>
    %65 = vector.shape_cast %64 : vector<8xf32> to vector<8x1xf32>
    %cst_27 = arith.constant -1.000000e+30 : f32
    %66 = vector.broadcast %cst_27 : f32 to vector<8x1xf32>
    %67 = arith.maximumf %65, %66 : vector<8x1xf32>
    %68 = vector.broadcast %67 : vector<8x1xf32> to vector<8x10xf32>
    %69 = arith.subf %63, %68 : vector<8x10xf32>
    %70 = math.exp %69 : vector<8x10xf32>
    %cst_28 = arith.constant dense<0.000000e+00> : vector<8xf32>
    %71 = vector.multi_reduction <add>, %70, %cst_28 [1] : vector<8x10xf32> to vector<8xf32>
    %72 = vector.shape_cast %71 : vector<8xf32> to vector<8x1xf32>
    %cst_29 = arith.constant 1.000000e-30 : f32
    %73 = vector.broadcast %cst_29 : f32 to vector<8x1xf32>
    %74 = arith.maximumf %72, %73 : vector<8x1xf32>
    %75 = tpu.reciprocal %74 {approx = true} : vector<8x1xf32> -> vector<8x1xf32>
    %76 = vector.broadcast %75 : vector<8x1xf32> to vector<8x10xf32>
    %77 = arith.mulf %70, %76 : vector<8x10xf32>
    %78 = arith.truncf %77 : vector<8x10xf32> to vector<8x10xbf16>
    %cst_30 = arith.constant dense<0.000000e+00> : vector<8x8xf32>
    %79 = tpu.matmul %78, %58, %cst_30 {dimension_numbers = #tpu.dot_dimension_numbers<[1], [0], [0], [1], [0, 0, 1, 1], [], []>} : vector<8x10xbf16>, vector<10x8xbf16>, vector<8x8xf32> -> vector<8x8xf32>
    %c0_31 = arith.constant 0 : index
    %c16 = arith.constant 16 : index
    %80 = vector.load %arg10[%c0_31, %c16] : memref<8x32xf32, #tpu.memory_space<vmem>>, vector<8x8xf32>
    tpu.vector_store %arg10[%c0_31, %c16], %79 {strides = array<i32>} : memref<8x32xf32, #tpu.memory_space<vmem>>, vector<8x8xf32>,
    %81 = vector.extract_strided_slice %1 {offsets = [0, 24], sizes = [8, 8], strides = [1, 1]} : vector<8x32xbf16> to vector<8x8xbf16>
    %82 = vector.extract_strided_slice %3 {offsets = [0, 24], sizes = [10, 8], strides = [1, 1]} : vector<10x64xbf16> to vector<10x8xbf16>
    %83 = vector.extract_strided_slice %3 {offsets = [0, 56], sizes = [10, 8], strides = [1, 1]} : vector<10x64xbf16> to vector<10x8xbf16>
    %cst_32 = arith.constant dense<0.000000e+00> : vector<8x10xf32>
    %84 = tpu.matmul %81, %82, %cst_32 {dimension_numbers = #tpu.dot_dimension_numbers<[1], [1], [0], [0], [0, 0, 1, 0], [], []>} : vector<8x8xbf16>, vector<10x8xbf16>, vector<8x10xf32> -> vector<8x10xf32>
    %cst_33 = arith.constant 0.353553385 : f32
    %85 = vector.broadcast %cst_33 : f32 to vector<8x10xf32>
    %86 = arith.mulf %84, %85 : vector<8x10xf32>
    %87 = vector.broadcast %5 : vector<1x10xf32> to vector<8x10xf32>
    %88 = arith.addf %86, %87 : vector<8x10xf32>
    %cst_34 = arith.constant dense<0xFF800000> : vector<8xf32>
    %89 = vector.multi_reduction <maximumf>, %88, %cst_34 [1] : vector<8x10xf32> to vector<8xf32>
    %90 = vector.shape_cast %89 : vector<8xf32> to vector<8x1xf32>
    %cst_35 = arith.constant -1.000000e+30 : f32
    %91 = vector.broadcast %cst_35 : f32 to vector<8x1xf32>
    %92 = arith.maximumf %90, %91 : vector<8x1xf32>
    %93 = vector.broadcast %92 : vector<8x1xf32> to vector<8x10xf32>
    %94 = arith.subf %88, %93 : vector<8x10xf32>
    %95 = math.exp %94 : vector<8x10xf32>
    %cst_36 = arith.constant dense<0.000000e+00> : vector<8xf32>
    %96 = vector.multi_reduction <add>, %95, %cst_36 [1] : vector<8x10xf32> to vector<8xf32>
    %97 = vector.shape_cast %96 : vector<8xf32> to vector<8x1xf32>
    %cst_37 = arith.constant 1.000000e-30 : f32
    %98 = vector.broadcast %cst_37 : f32 to vector<8x1xf32>
    %99 = arith.maximumf %97, %98 : vector<8x1xf32>
    %100 = tpu.reciprocal %99 {approx = true} : vector<8x1xf32> -> vector<8x1xf32>
    %101 = vector.broadcast %100 : vector<8x1xf32> to vector<8x10xf32>
    %102 = arith.mulf %95, %101 : vector<8x10xf32>
    %103 = arith.truncf %102 : vector<8x10xf32> to vector<8x10xbf16>
    %cst_38 = arith.constant dense<0.000000e+00> : vector<8x8xf32>
    %104 = tpu.matmul %103, %83, %cst_38 {dimension_numbers = #tpu.dot_dimension_numbers<[1], [0], [0], [1], [0, 0, 1, 1], [], []>} : vector<8x10xbf16>, vector<10x8xbf16>, vector<8x8xf32> -> vector<8x8xf32>
    %c0_39 = arith.constant 0 : index
    %c24 = arith.constant 24 : index
    %105 = vector.load %arg10[%c0_39, %c24] : memref<8x32xf32, #tpu.memory_space<vmem>>, vector<8x8xf32>
    tpu.vector_store %arg10[%c0_39, %c24], %104 {strides = array<i32>} : memref<8x32xf32, #tpu.memory_space<vmem>>, vector<8x8xf32>,
    %c0_40 = arith.constant 0 : index
    %c0_41 = arith.constant 0 : index
    %106 = vector.load %arg10[%c0_40, %c0_41] : memref<8x32xf32, #tpu.memory_space<vmem>>, vector<8x32xf32>
    %107 = arith.truncf %106 : vector<8x32xf32> to vector<8x32xbf16>
    %c0_42 = arith.constant 0 : index
    %c0_43 = arith.constant 0 : index
    %108 = vector.load %arg5[%c0_42, %c0_43] : memref<32x32xbf16, #tpu.memory_space<vmem>>, vector<32x32xbf16>
    %cst_44 = arith.constant dense<0.000000e+00> : vector<8x32xf32>
    %109 = tpu.matmul %107, %108, %cst_44 {dimension_numbers = #tpu.dot_dimension_numbers<[1], [0], [0], [1], [0, 0, 1, 1], [], []>} : vector<8x32xbf16>, vector<32x32xbf16>, vector<8x32xf32> -> vector<8x32xf32>
    %c0_45 = arith.constant 0 : index
    %c0_46 = arith.constant 0 : index
    %110 = vector.load %arg6[%c0_45, %c0_46] : memref<1x32xf32, #tpu.memory_space<vmem>>, vector<1x32xf32>
    %111 = vector.broadcast %110 : vector<1x32xf32> to vector<8x32xf32>
    %112 = arith.addf %109, %111 : vector<8x32xf32>
    %c0_47 = arith.constant 0 : index
    %c0_48 = arith.constant 0 : index
    %c0_49 = arith.constant 0 : index
    %113 = vector.load %arg4[%c0_47, %c0_48, %c0_49] : memref<1x8x32xf32, #tpu.memory_space<vmem>>, vector<1x8x32xf32>
    %114 = vector.shape_cast %113 : vector<1x8x32xf32> to vector<8x32xf32>
    %115 = arith.addf %112, %114 : vector<8x32xf32>
    %cst_50 = arith.constant dense<0.000000e+00> : vector<8xf32>
    %116 = vector.multi_reduction <add>, %115, %cst_50 [1] : vector<8x32xf32> to vector<8xf32>
    %117 = vector.shape_cast %116 : vector<8xf32> to vector<8x1xf32>
    %cst_51 = arith.constant 3.200000e+01 : f32
    %118 = vector.broadcast %cst_51 : f32 to vector<8x1xf32>
    %119 = arith.divf %117, %118 : vector<8x1xf32>
    %120 = vector.broadcast %119 : vector<8x1xf32> to vector<8x32xf32>
    %121 = arith.subf %115, %120 : vector<8x32xf32>
    %122 = arith.mulf %121, %121 : vector<8x32xf32>
    %cst_52 = arith.constant dense<0.000000e+00> : vector<8xf32>
    %123 = vector.multi_reduction <add>, %122, %cst_52 [1] : vector<8x32xf32> to vector<8xf32>
    %124 = vector.shape_cast %123 : vector<8xf32> to vector<8x1xf32>
    %cst_53 = arith.constant 3.200000e+01 : f32
    %125 = vector.broadcast %cst_53 : f32 to vector<8x1xf32>
    %126 = arith.divf %124, %125 : vector<8x1xf32>
    %cst_54 = arith.constant 9.99999974E-6 : f32
    %127 = vector.broadcast %cst_54 : f32 to vector<8x1xf32>
    %128 = arith.addf %126, %127 : vector<8x1xf32>
    %129 = math.rsqrt %128 : vector<8x1xf32>
    %130 = vector.broadcast %129 : vector<8x1xf32> to vector<8x32xf32>
    %131 = arith.mulf %121, %130 : vector<8x32xf32>
    %c0_55 = arith.constant 0 : index
    %c0_56 = arith.constant 0 : index
    %132 = vector.load %arg7[%c0_55, %c0_56] : memref<1x32xf32, #tpu.memory_space<vmem>>, vector<1x32xf32>
    %133 = vector.broadcast %132 : vector<1x32xf32> to vector<8x32xf32>
    %134 = arith.mulf %131, %133 : vector<8x32xf32>
    %c0_57 = arith.constant 0 : index
    %c0_58 = arith.constant 0 : index
    %135 = vector.load %arg8[%c0_57, %c0_58] : memref<1x32xf32, #tpu.memory_space<vmem>>, vector<1x32xf32>
    %136 = vector.broadcast %135 : vector<1x32xf32> to vector<8x32xf32>
    %137 = arith.addf %134, %136 : vector<8x32xf32>
    %c0_59 = arith.constant 0 : index
    %c0_60 = arith.constant 0 : index
    %c0_61 = arith.constant 0 : index
    %138 = vector.load %arg9[%c0_59, %c0_60, %c0_61] : memref<1x8x32xf32, #tpu.memory_space<vmem>>, vector<1x8x32xf32>
    %139 = vector.shape_cast %138 : vector<1x8x32xf32> to vector<8x32xf32>
    %140 = vector.shape_cast %137 : vector<8x32xf32> to vector<1x8x32xf32>
    tpu.vector_store %arg9[%c0_59, %c0_60, %c0_61], %140 {strides = array<i32>} : memref<1x8x32xf32, #tpu.memory_space<vmem>>, vector<1x8x32xf32>,
    return
  }
  func.func @transform_0(%arg0: i32) -> (i32, i32, i32) {
    %c0_i32 = arith.constant 0 : i32
    %c0_i32_0 = arith.constant 0 : i32
    %c0_i32_1 = arith.constant 0 : i32
    return %arg0, %c0_i32, %c0_i32_0 : i32, i32, i32
  }
  func.func @transform_1(%arg0: i32) -> (i32, i32, i32) {
    %c0_i32 = arith.constant 0 : i32
    %c0_i32_0 = arith.constant 0 : i32
    %c0_i32_1 = arith.constant 0 : i32
    return %arg0, %c0_i32, %c0_i32_0 : i32, i32, i32
  }
  func.func @transform_2(%arg0: i32) -> (i32, i32, i32) {
    %c0_i32 = arith.constant 0 : i32
    %c0_i32_0 = arith.constant 0 : i32
    %c0_i32_1 = arith.constant 0 : i32
    return %arg0, %c0_i32, %c0_i32_0 : i32, i32, i32
  }
  func.func @transform_3(%arg0: i32) -> (i32, i32, i32) {
    %c0_i32 = arith.constant 0 : i32
    %c0_i32_0 = arith.constant 0 : i32
    %c0_i32_1 = arith.constant 0 : i32
    return %arg0, %c0_i32, %c0_i32_0 : i32, i32, i32
  }
  func.func @transform_4(%arg0: i32) -> (i32, i32) {
    %c0_i32 = arith.constant 0 : i32
    %c0_i32_0 = arith.constant 0 : i32
    %c0_i32_1 = arith.constant 0 : i32
    return %c0_i32, %c0_i32_0 : i32, i32
  }
  func.func @transform_5(%arg0: i32) -> (i32, i32) {
    %c0_i32 = arith.constant 0 : i32
    %c0_i32_0 = arith.constant 0 : i32
    %c0_i32_1 = arith.constant 0 : i32
    return %c0_i32, %c0_i32_0 : i32, i32
  }
  func.func @transform_6(%arg0: i32) -> (i32, i32) {
    %c0_i32 = arith.constant 0 : i32
    %c0_i32_0 = arith.constant 0 : i32
    %c0_i32_1 = arith.constant 0 : i32
    return %c0_i32, %c0_i32_0 : i32, i32
  }
  func.func @transform_7(%arg0: i32) -> (i32, i32) {
    %c0_i32 = arith.constant 0 : i32
    %c0_i32_0 = arith.constant 0 : i32
    %c0_i32_1 = arith.constant 0 : i32
    return %c0_i32, %c0_i32_0 : i32, i32
  }
  func.func @transform_8(%arg0: i32) -> (i32, i32, i32) {
    %c0_i32 = arith.constant 0 : i32
    %c0_i32_0 = arith.constant 0 : i32
    %c0_i32_1 = arith.constant 0 : i32
    return %arg0, %c0_i32, %c0_i32_0 : i32, i32, i32
  }
}

module attributes {stable_mosaic.version = 11 : i64} {
  func.func @_ffn_block_kernel(%arg0: i32, %arg1: memref<16x32xf32, #tpu.memory_space<vmem>>, %arg2: memref<32x64xbf16, #tpu.memory_space<vmem>>, %arg3: memref<1x64xf32, #tpu.memory_space<vmem>>, %arg4: memref<64x32xbf16, #tpu.memory_space<vmem>>, %arg5: memref<1x32xf32, #tpu.memory_space<vmem>>, %arg6: memref<1x32xf32, #tpu.memory_space<vmem>>, %arg7: memref<1x32xf32, #tpu.memory_space<vmem>>, %arg8: memref<16x32xf32, #tpu.memory_space<vmem>>) attributes {dimension_semantics = [#tpu.dimension_semantics<parallel>], iteration_bounds = array<i64: 1>, scalar_prefetch = 0 : i64, scratch_operands = 0 : i64, tpu.core_type = #tpu.core_type<tc>, window_params = [{transform_indices = @transform_0, window_bounds = array<i64: 16, 32>}, {pipeline_mode = #tpu.pipeline_mode<synchronous>, transform_indices = @transform_1, window_bounds = array<i64: 32, 64>}, {pipeline_mode = #tpu.pipeline_mode<synchronous>, transform_indices = @transform_2, window_bounds = array<i64: 1, 64>}, {pipeline_mode = #tpu.pipeline_mode<synchronous>, transform_indices = @transform_3, window_bounds = array<i64: 64, 32>}, {pipeline_mode = #tpu.pipeline_mode<synchronous>, transform_indices = @transform_4, window_bounds = array<i64: 1, 32>}, {pipeline_mode = #tpu.pipeline_mode<synchronous>, transform_indices = @transform_5, window_bounds = array<i64: 1, 32>}, {pipeline_mode = #tpu.pipeline_mode<synchronous>, transform_indices = @transform_6, window_bounds = array<i64: 1, 32>}, {transform_indices = @transform_7, window_bounds = array<i64: 16, 32>}]} {
    %c0 = arith.constant 0 : index
    %c0_0 = arith.constant 0 : index
    %0 = vector.load %arg1[%c0, %c0_0] : memref<16x32xf32, #tpu.memory_space<vmem>>, vector<16x32xf32>
    %1 = arith.truncf %0 : vector<16x32xf32> to vector<16x32xbf16>
    %c0_1 = arith.constant 0 : index
    %c0_2 = arith.constant 0 : index
    %2 = vector.load %arg2[%c0_1, %c0_2] : memref<32x64xbf16, #tpu.memory_space<vmem>>, vector<32x64xbf16>
    %cst = arith.constant dense<0.000000e+00> : vector<16x64xf32>
    %3 = tpu.matmul %1, %2, %cst {dimension_numbers = #tpu.dot_dimension_numbers<[1], [0], [0], [1], [0, 0, 1, 1], [], []>} : vector<16x32xbf16>, vector<32x64xbf16>, vector<16x64xf32> -> vector<16x64xf32>
    %c0_3 = arith.constant 0 : index
    %c0_4 = arith.constant 0 : index
    %4 = vector.load %arg3[%c0_3, %c0_4] : memref<1x64xf32, #tpu.memory_space<vmem>>, vector<1x64xf32>
    %5 = vector.broadcast %4 : vector<1x64xf32> to vector<16x64xf32>
    %6 = arith.addf %3, %5 : vector<16x64xf32>
    %cst_5 = arith.constant 0.000000e+00 : f32
    %7 = vector.broadcast %cst_5 : f32 to vector<16x64xf32>
    %8 = arith.maximumf %6, %7 : vector<16x64xf32>
    %9 = arith.truncf %8 : vector<16x64xf32> to vector<16x64xbf16>
    %c0_6 = arith.constant 0 : index
    %c0_7 = arith.constant 0 : index
    %10 = vector.load %arg4[%c0_6, %c0_7] : memref<64x32xbf16, #tpu.memory_space<vmem>>, vector<64x32xbf16>
    %cst_8 = arith.constant dense<0.000000e+00> : vector<16x32xf32>
    %11 = tpu.matmul %9, %10, %cst_8 {dimension_numbers = #tpu.dot_dimension_numbers<[1], [0], [0], [1], [0, 0, 1, 1], [], []>} : vector<16x64xbf16>, vector<64x32xbf16>, vector<16x32xf32> -> vector<16x32xf32>
    %c0_9 = arith.constant 0 : index
    %c0_10 = arith.constant 0 : index
    %12 = vector.load %arg5[%c0_9, %c0_10] : memref<1x32xf32, #tpu.memory_space<vmem>>, vector<1x32xf32>
    %13 = vector.broadcast %12 : vector<1x32xf32> to vector<16x32xf32>
    %14 = arith.addf %11, %13 : vector<16x32xf32>
    %15 = arith.addf %0, %14 : vector<16x32xf32>
    %cst_11 = arith.constant dense<0.000000e+00> : vector<16xf32>
    %16 = vector.multi_reduction <add>, %15, %cst_11 [1] : vector<16x32xf32> to vector<16xf32>
    %17 = vector.shape_cast %16 : vector<16xf32> to vector<16x1xf32>
    %cst_12 = arith.constant 3.200000e+01 : f32
    %18 = vector.broadcast %cst_12 : f32 to vector<16x1xf32>
    %19 = arith.divf %17, %18 : vector<16x1xf32>
    %20 = vector.broadcast %19 : vector<16x1xf32> to vector<16x32xf32>
    %21 = arith.subf %15, %20 : vector<16x32xf32>
    %22 = arith.mulf %21, %21 : vector<16x32xf32>
    %cst_13 = arith.constant dense<0.000000e+00> : vector<16xf32>
    %23 = vector.multi_reduction <add>, %22, %cst_13 [1] : vector<16x32xf32> to vector<16xf32>
    %24 = vector.shape_cast %23 : vector<16xf32> to vector<16x1xf32>
    %cst_14 = arith.constant 3.200000e+01 : f32
    %25 = vector.broadcast %cst_14 : f32 to vector<16x1xf32>
    %26 = arith.divf %24, %25 : vector<16x1xf32>
    %cst_15 = arith.constant 9.99999974E-6 : f32
    %27 = vector.broadcast %cst_15 : f32 to vector<16x1xf32>
    %28 = arith.addf %26, %27 : vector<16x1xf32>
    %29 = math.rsqrt %28 : vector<16x1xf32>
    %30 = vector.broadcast %29 : vector<16x1xf32> to vector<16x32xf32>
    %31 = arith.mulf %21, %30 : vector<16x32xf32>
    %c0_16 = arith.constant 0 : index
    %c0_17 = arith.constant 0 : index
    %32 = vector.load %arg6[%c0_16, %c0_17] : memref<1x32xf32, #tpu.memory_space<vmem>>, vector<1x32xf32>
    %33 = vector.broadcast %32 : vector<1x32xf32> to vector<16x32xf32>
    %34 = arith.mulf %31, %33 : vector<16x32xf32>
    %c0_18 = arith.constant 0 : index
    %c0_19 = arith.constant 0 : index
    %35 = vector.load %arg7[%c0_18, %c0_19] : memref<1x32xf32, #tpu.memory_space<vmem>>, vector<1x32xf32>
    %36 = vector.broadcast %35 : vector<1x32xf32> to vector<16x32xf32>
    %37 = arith.addf %34, %36 : vector<16x32xf32>
    %c0_20 = arith.constant 0 : index
    %c0_21 = arith.constant 0 : index
    %38 = vector.load %arg8[%c0_20, %c0_21] : memref<16x32xf32, #tpu.memory_space<vmem>>, vector<16x32xf32>
    tpu.vector_store %arg8[%c0_20, %c0_21], %37 {strides = array<i32>} : memref<16x32xf32, #tpu.memory_space<vmem>>, vector<16x32xf32>,
    return
  }
  func.func @transform_0(%arg0: i32) -> (i32, i32) {
    %c0_i32 = arith.constant 0 : i32
    %c0_i32_0 = arith.constant 0 : i32
    return %arg0, %c0_i32 : i32, i32
  }
  func.func @transform_1(%arg0: i32) -> (i32, i32) {
    %c0_i32 = arith.constant 0 : i32
    %c0_i32_0 = arith.constant 0 : i32
    %c0_i32_1 = arith.constant 0 : i32
    return %c0_i32, %c0_i32_0 : i32, i32
  }
  func.func @transform_2(%arg0: i32) -> (i32, i32) {
    %c0_i32 = arith.constant 0 : i32
    %c0_i32_0 = arith.constant 0 : i32
    %c0_i32_1 = arith.constant 0 : i32
    return %c0_i32, %c0_i32_0 : i32, i32
  }
  func.func @transform_3(%arg0: i32) -> (i32, i32) {
    %c0_i32 = arith.constant 0 : i32
    %c0_i32_0 = arith.constant 0 : i32
    %c0_i32_1 = arith.constant 0 : i32
    return %c0_i32, %c0_i32_0 : i32, i32
  }
  func.func @transform_4(%arg0: i32) -> (i32, i32) {
    %c0_i32 = arith.constant 0 : i32
    %c0_i32_0 = arith.constant 0 : i32
    %c0_i32_1 = arith.constant 0 : i32
    return %c0_i32, %c0_i32_0 : i32, i32
  }
  func.func @transform_5(%arg0: i32) -> (i32, i32) {
    %c0_i32 = arith.constant 0 : i32
    %c0_i32_0 = arith.constant 0 : i32
    %c0_i32_1 = arith.constant 0 : i32
    return %c0_i32, %c0_i32_0 : i32, i32
  }
  func.func @transform_6(%arg0: i32) -> (i32, i32) {
    %c0_i32 = arith.constant 0 : i32
    %c0_i32_0 = arith.constant 0 : i32
    %c0_i32_1 = arith.constant 0 : i32
    return %c0_i32, %c0_i32_0 : i32, i32
  }
  func.func @transform_7(%arg0: i32) -> (i32, i32) {
    %c0_i32 = arith.constant 0 : i32
    %c0_i32_0 = arith.constant 0 : i32
    return %arg0, %c0_i32 : i32, i32
  }
}

module attributes {stable_mosaic.version = 11 : i64} {
  func.func @_linear_kernel_oneshot(%arg0: i32, %arg1: i32, %arg2: i32, %arg3: memref<16x32xf32, #tpu.memory_space<vmem>>, %arg4: memref<32x16xbf16, #tpu.memory_space<vmem>>, %arg5: memref<1x16xf32, #tpu.memory_space<vmem>>, %arg6: memref<16x16xf32, #tpu.memory_space<vmem>>) attributes {dimension_semantics = [#tpu.dimension_semantics<parallel>, #tpu.dimension_semantics<parallel>, #tpu.dimension_semantics<arbitrary>], iteration_bounds = array<i64: 1, 1, 1>, scalar_prefetch = 0 : i64, scratch_operands = 0 : i64, tpu.core_type = #tpu.core_type<tc>, window_params = [{transform_indices = @transform_0, window_bounds = array<i64: 16, 32>}, {transform_indices = @transform_1, window_bounds = array<i64: 32, 16>}, {transform_indices = @transform_2, window_bounds = array<i64: 1, 16>}, {transform_indices = @transform_3, window_bounds = array<i64: 16, 16>}]} {
    %c0 = arith.constant 0 : index
    %c0_0 = arith.constant 0 : index
    %0 = vector.load %arg3[%c0, %c0_0] : memref<16x32xf32, #tpu.memory_space<vmem>>, vector<16x32xf32>
    %1 = arith.truncf %0 : vector<16x32xf32> to vector<16x32xbf16>
    %c0_1 = arith.constant 0 : index
    %c0_2 = arith.constant 0 : index
    %2 = vector.load %arg4[%c0_1, %c0_2] : memref<32x16xbf16, #tpu.memory_space<vmem>>, vector<32x16xbf16>
    %cst = arith.constant dense<0.000000e+00> : vector<16x16xf32>
    %3 = tpu.matmul %1, %2, %cst {dimension_numbers = #tpu.dot_dimension_numbers<[1], [0], [0], [1], [0, 0, 1, 1], [], []>} : vector<16x32xbf16>, vector<32x16xbf16>, vector<16x16xf32> -> vector<16x16xf32>
    %c0_3 = arith.constant 0 : index
    %c0_4 = arith.constant 0 : index
    %4 = vector.load %arg5[%c0_3, %c0_4] : memref<1x16xf32, #tpu.memory_space<vmem>>, vector<1x16xf32>
    %5 = vector.broadcast %4 : vector<1x16xf32> to vector<16x16xf32>
    %6 = arith.addf %3, %5 : vector<16x16xf32>
    %c0_5 = arith.constant 0 : index
    %c0_6 = arith.constant 0 : index
    %7 = vector.load %arg6[%c0_5, %c0_6] : memref<16x16xf32, #tpu.memory_space<vmem>>, vector<16x16xf32>
    tpu.vector_store %arg6[%c0_5, %c0_6], %6 {strides = array<i32>} : memref<16x16xf32, #tpu.memory_space<vmem>>, vector<16x16xf32>,
    return
  }
  func.func @transform_0(%arg0: i32, %arg1: i32, %arg2: i32) -> (i32, i32) {
    %c0_i32 = arith.constant 0 : i32
    return %arg0, %arg2 : i32, i32
  }
  func.func @transform_1(%arg0: i32, %arg1: i32, %arg2: i32) -> (i32, i32) {
    %c0_i32 = arith.constant 0 : i32
    return %arg2, %arg1 : i32, i32
  }
  func.func @transform_2(%arg0: i32, %arg1: i32, %arg2: i32) -> (i32, i32) {
    %c0_i32 = arith.constant 0 : i32
    %c0_i32_0 = arith.constant 0 : i32
    return %c0_i32, %arg1 : i32, i32
  }
  func.func @transform_3(%arg0: i32, %arg1: i32, %arg2: i32) -> (i32, i32) {
    %c0_i32 = arith.constant 0 : i32
    return %arg0, %arg1 : i32, i32
  }
}

</mosaic_0001>

<bundles_post_ra>
// kernel: text_decode_forward.13
= control target key start
LH: loop header
LB: loop body
LE: loop exit
PB: predicated region body
PF: predicated region fallthrough
CT: control target
= control target key end

     0   :  { %v124_v0 = vmov 0.0   ;;  %vm125_vm0 = vmmov 0   ;;  %vm41_vm1 = vcmask 261120   ;;  %vm94_vm2 = vcmask 781312   ;;  %s167_s1 = inlined_call_operand.vmem [shape: bf16[32,96], index: 1, kind: input, shape index: {}]   ;;  %s168_s0 = inlined_call_operand.vmem [shape: f32[16,32], index: 0, kind: input, shape index: {}]   ;;  %s169_s2 = inlined_call_operand.vmem [shape: f32[1,96], index: 2, kind: input, shape index: {}]   ;;  %s170_s3 = inlined_call_operand.vmem [shape: bf16[16,96], index: 3, kind: output, shape index: {}]  }
   0x1   :  { %112 = vmatprep.subr.bf16.mxu0 %v124_v0  ;;  %v122_v1 = vld [vmem:[%s167_s1] sm:$0xff]   ;;  %116 = vmatprep.mubr.msk.bf16.mxu0 %vm125_vm0, %v124_v0  ;;  %v123_v2 = vld [vmem:[%s167_s1 + $0x8] sm:$0xff]  }
   0x2   :  { %113 = vmatpush3.bf16.msra.mxu0 %v122_v1  ;;  %v15_v3 = vld [vmem:[%s168_s0] sm:$0xff]  ;;  %v16_v4 = vld [vmem:[%s168_s0 + $0x8] sm:$0xff] }
   0x3   :  { %114 = vmatprep.subr.bf16.mxu0 %v124_v0  ;;  %v17_v5 = vpack.c.bf16 %v16_v4, %v15_v3  ;;  %v101_v6 = vld [vmem:[%s169_s2] ss:$0 sm:$0xff] }
   0x6   :  { %115 = vmatpush3.bf16.msra.mxu0 %v123_v2 }
   0x9   :  { %117 = vmatmul.mubr.msk.bf16.vlgmr.msra.gmra.mrb[0].mxu0 %vm41_vm1, %v17_v5 }
  0xdc   :  { %v79_v7 = vpop.f32.mrb[0].mxu0 }
  0xdd   :  { %v80_v8 = vadd.f32 %v101_v6, %v79_v7  ;;  %v118_v9 = vpop.f32.mrb[1].mxu0 }
  0xde   :  { %v82_v10 = vpop.f32.mrb[2].mxu0 }
  0xdf   :  { %v107_v11 = vpack.c.bf16 %v80_v8, %v80_v8  ;;  %v83_v12 = vadd.f32 %v101_v6, %v82_v10  ;;  %v119_v13 = vpop.f32.mrb[3].mxu0 }
  0xe1   :  { %95 = vst.msk [vmem:[%s170_s3] sm:$0xf] %vm94_vm2, %v107_v11  ;;  %v108_v14 = vpack.c.bf16 %v83_v12, %v83_v12 }
  0xe3   :  { %96 = vst.msk [vmem:[%s170_s3 + $0x4] sm:$0xf] %vm94_vm2, %v108_v14 }

// kernel: text_decode_forward.15
= control target key start
LH: loop header
LB: loop body
LE: loop exit
PB: predicated region body
PF: predicated region fallthrough
CT: control target
= control target key end

     0   :  { %v124_v0 = vmov 0.0   ;;  %vm125_vm0 = vmmov 0   ;;  %vm41_vm1 = vcmask 261120   ;;  %vm94_vm2 = vcmask 257024   ;;  %s167_s1 = inlined_call_operand.vmem [shape: bf16[32,32], index: 1, kind: input, shape index: {}]   ;;  %s168_s0 = inlined_call_operand.vmem [shape: f32[16,32], index: 0, kind: input, shape index: {}]   ;;  %s169_s2 = inlined_call_operand.vmem [shape: f32[1,32], index: 2, kind: input, shape index: {}]   ;;  %s170_s3 = inlined_call_operand.vmem [shape: bf16[16,32], index: 3, kind: output, shape index: {}]  }
   0x1   :  { %112 = vmatprep.subr.bf16.mxu0 %v124_v0  ;;  %v122_v1 = vld [vmem:[%s167_s1] sm:$0xff]   ;;  %116 = vmatprep.mubr.msk.bf16.mxu0 %vm125_vm0, %v124_v0  ;;  %v123_v2 = vld [vmem:[%s167_s1 + $0x8] sm:$0xff]  }
   0x2   :  { %113 = vmatpush3.bf16.msra.mxu0 %v122_v1  ;;  %v15_v3 = vld [vmem:[%s168_s0] sm:$0xff]  ;;  %v16_v4 = vld [vmem:[%s168_s0 + $0x8] sm:$0xff] }
   0x3   :  { %114 = vmatprep.subr.bf16.mxu0 %v124_v0  ;;  %v17_v5 = vpack.c.bf16 %v16_v4, %v15_v3  ;;  %v101_v6 = vld [vmem:[%s169_s2] ss:$0 sm:$0xff] }
   0x6   :  { %115 = vmatpush3.bf16.msra.mxu0 %v123_v2 }
   0x9   :  { %117 = vmatmul.mubr.msk.bf16.vlgmr.msra.gmra.mrb[0].mxu0 %vm41_vm1, %v17_v5 }
  0xdc   :  { %v79_v7 = vpop.f32.mrb[0].mxu0 }
  0xdd   :  { %v80_v8 = vadd.f32 %v101_v6, %v79_v7  ;;  %v118_v9 = vpop.f32.mrb[1].mxu0 }
  0xde   :  { %v82_v10 = vpop.f32.mrb[2].mxu0 }
  0xdf   :  { %v107_v11 = vpack.c.bf16 %v80_v8, %v80_v8  ;;  %v83_v12 = vadd.f32 %v101_v6, %v82_v10  ;;  %v119_v13 = vpop.f32.mrb[3].mxu0 }
  0xe1   :  { %95 = vst.msk [vmem:[%s170_s3] sm:$0xf] %vm94_vm2, %v107_v11  ;;  %v108_v14 = vpack.c.bf16 %v83_v12, %v83_v12 }
  0xe3   :  { %96 = vst.msk [vmem:[%s170_s3 + $0x4] sm:$0xf] %vm94_vm2, %v108_v14 }

// kernel: text_decode_forward.16
= control target key start
LH: loop header
LB: loop body
LE: loop exit
PB: predicated region body
PF: predicated region fallthrough
CT: control target
= control target key end

     0   :  { %vm43_vm0 = vcmask 261120   ;;  %vm114_vm1 = vcmask 517120   ;;  %vm111_vm2 = vcmask 519168   ;;  %s192_s1 = inlined_call_operand.vmem [shape: bf16[32,64], index: 1, kind: input, shape index: {}]   ;;  %s193_s0 = inlined_call_operand.vmem [shape: f32[20,32], index: 0, kind: input, shape index: {}]   ;;  %s194_s2 = inlined_call_operand.vmem [shape: f32[1,64], index: 2, kind: input, shape index: {}]   ;;  %s195_s3 = inlined_call_operand.vmem [shape: bf16[20,64], index: 3, kind: output, shape index: {}]  }
   0x1   :  { %v143_v0 = vld [vmem:[%s192_s1] sm:$0xff]   ;;  %v144_v1 = vld [vmem:[%s192_s1 + $0x8] sm:$0xff]   ;;  %v17_v4 = vld [vmem:[%s193_s0 + $0x10] sm:$0xf] }
   0x2   :  { %135 = vmatprep.subr.bf16.mxu0 %v143_v0  ;;  %v15_v2 = vld [vmem:[%s193_s0] sm:$0xff]  ;;  %v16_v3 = vld [vmem:[%s193_s0 + $0x8] sm:$0xff]  ;;  %v19_v6 = vpack.c.bf16 %v17_v4, %v17_v4 }
   0x3   :  { %136 = vmatpush3.bf16.msra.mxu0 %v143_v0  ;;  %v18_v5 = vpack.c.bf16 %v16_v3, %v15_v2  ;;  %v120_v7 = vld [vmem:[%s194_s2] ss:$0 sm:$0xff] }
   0x4   :  { %137 = vmatprep.subr.bf16.mxu0 %v144_v1 }
   0x5   :  { %139 = vmatprep.mubr.msk.bf16.mxu0 %vm43_vm0, %v18_v5 }
   0x7   :  { %138 = vmatpush3.bf16.msra.mxu0 %v144_v1 }
   0xa   :  { %140 = vmatmul.mubr.msk.bf16.vlgmr.msra.gmra.mrb[0].mxu0 %vm43_vm0, %v19_v6 }
  0xdd   :  { %v141_v8 = vpop.f32.mrb[0].mxu0 }
  0xde   :  { %v93_v9 = vadd.f32 %v141_v8, %v120_v7  ;;  %v84_v10 = vpop.f32.mrb[1].mxu0 }
  0xdf   :  { %v85_v11 = vadd.f32 %v120_v7, %v84_v10  ;;  %v142_v12 = vpop.f32.mrb[2].mxu0 }
  0xe0   :  { %v130_v13 = vpack.c.bf16 %v93_v9, %v93_v9  ;;  %v87_v14 = vpop.f32.mrb[3].mxu0 }
  0xe1   :  { %v128_v15 = vpack.c.bf16 %v85_v11, %v85_v11  ;;  %v88_v16 = vadd.f32 %v120_v7, %v87_v14 }
  0xe2   :  { %115 = vst.msk [vmem:[%s195_s3 + $0x8] sm:$0x3] %vm114_vm1, %v130_v13 }
  0xe3   :  { %112 = vst.msk [vmem:[%s195_s3] sm:$0xf] %vm111_vm2, %v128_v15  ;;  %v129_v17 = vpack.c.bf16 %v88_v16, %v88_v16 }
  0xe5   :  { %113 = vst.msk [vmem:[%s195_s3 + $0x4] sm:$0xf] %vm111_vm2, %v129_v17 }

// kernel: text_decode_forward.14
= control target key start
LH: loop header
LB: loop body
LE: loop exit
PB: predicated region body
PF: predicated region fallthrough
CT: control target
= control target key end

     0   :  { %s1212_s27 = smov 0   ;;  %s1334_s0 = inlined_call_operand.vmem [shape: bf16[2,8,96], index: 0, kind: input, shape index: {}]   ;;  %s1335_s1 = inlined_call_operand.vmem [shape: f32[8,8], index: 1, kind: input, shape index: {}]   ;;  %s1336_s2 = inlined_call_operand.vmem [shape: f32[2,1,8], index: 2, kind: input, shape index: {}]   ;;  %s1337_s3 = inlined_call_operand.vmem [shape: f32[2,8,32], index: 3, kind: input, shape index: {}]   ;;  %s1338_s4 = inlined_call_operand.vmem [shape: bf16[32,32], index: 4, kind: input, shape index: {}]   ;;  %s1339_s5 = inlined_call_operand.vmem [shape: f32[1,32], index: 5, kind: input, shape index: {}]   ;;  %s1340_s6 = inlined_call_operand.vmem [shape: f32[1,32], index: 6, kind: input, shape index: {}]   ;;  %s1341_s7 = inlined_call_operand.vmem [shape: f32[1,32], index: 7, kind: input, shape index: {}]   ;;  %s1342_s8 = inlined_call_operand.vmem [shape: f32[2,8,32], index: 8, kind: output, shape index: {}]  }
   0x1 LB: > { %s997_s28 = sadd.s32 4294967295, %s1149_s27   ;;  %p1001_p0 = scmp.ge.s32.totalorder %s1149_s27, 1  ;;  %s1149_s27 = sphi %s1212_s27, %s18_s27  }
   0x2   : > { %p278_p1 = scmp.lt.s32.totalorder %s1149_s27, 3 }
   0x4   : > { %p279_p2 = pnand %p1001_p0, %p278_p1 }
   0x5   : > { %p317_p3 = scmp.lt.s32.totalorder (!%p279_p2), %s997_s28, 1  ;;  %v1151_v0 = vmov (!%p279_p2), 0.0   ;;  %vm1152_vm0 = vmmov (!%p279_p2), 0   ;;  %s1153_s11 = smov (!%p279_p2), 96   ;;  %vm348_vm1 = vcmask (!%p279_p2), 64512   ;;  %v334_v5 = vld [vmem:[%s1335_s1] sm:$0xff] (!%p279_p2) }
   0x6   : > { %282 = sbr.rel (%p279_p2) target bundleno = 2150 (0x866), region = 52  ;;  %1042 = vmatprep.subr.bf16.mxu0 (!%p279_p2), %v1151_v0  ;;  %1044 = vmatprep.mubr.msk.bf16.mxu0 (!%p279_p2), %vm1152_vm0, %v1151_v0  ;;  %s1154_s12 = smov (!%p279_p2), 64   ;;  %vm416_vm2 = vcmask (!%p279_p2), 1043456   ;;  %vm579_vm3 = vcmask (!%p279_p2), 130112   ;;  %vm699_vm4 = vcmask (!%p279_p2), 195712   ;;  %vm819_vm5 = vcmask (!%p279_p2), 261312  }
   0x7   : > { %1048 = vmatprep.subr.bf16.mxu1 (!%p279_p2), %v1151_v0  ;;  %1050 = vmatprep.mubr.msk.bf16.mxu1 (!%p279_p2), %vm1152_vm0, %v1151_v0  ;;  %s1155_s13 = smov (!%p279_p2), 88   ;;  %s1156_s19 = smov (!%p279_p2), 72   ;;  %vm846_vm6 = vcmask (!%p279_p2), 261120  }
   0x8   : > { %s1157_s20 = smov (!%p279_p2), 120   ;;  %s1158_s21 = smov (!%p279_p2), 80  }
   0x9   : > { %s1159_s22 = smov (!%p279_p2), 112   ;;  %s1160_s23 = smov (!%p279_p2), 104  }
   0xa   : > { %s1161_s24 = smov (!%p279_p2), 56   ;;  %s1162_s25 = smov (!%p279_p2), 48  }
   0xb   : > { %s1163_s26 = smov (!%p279_p2), 40  }
   0xd   : > { %s1344_s28 = smov (!%p317_p3, %s997_s28), 1 }
   0xe   : > { %s1002_s29 = sshll.u32 %s1344_s28, 2  ;;  %s323_s16 = scalar_lea.vmem %s1336_s2, %s1344_s28 }
   0xf   : > { %s320_s10 = scalar_lea.vmem %s1334_s0, %s1002_s29  ;;  %v1005_v6 = vld [vmem:[%s323_s16] ss:$0 sm:$0xff]  ;;  %s1164_s29 = smov 8  }
  0x10   : > { %v333_v1 = vld [vmem:[%s320_s10] sm:$0xf]  ;;  %v1249_v7 = vadd.f32 %v1005_v6, %v334_v5  ;;  %s1003_s14 = sshll.u32 %s1344_s28, 3 }
  0x11   : > { %v1232_v2 = vcombine.low %v333_v1, %v333_v1  ;;  %s327_s17 = scalar_lea.vmem %s1337_s3, %s1003_s14 }
  0x13   : > { %346 = vrot.lane.b32.xlu0 %v1232_v2, %s1153_s11  ;;  %411 = vrot.lane.b32.xlu1 %v1232_v2, %s1154_s12  ;;  %s1165_s12 = smov 16  }
  0x17   : > { %463 = vrot.lane.b32.xlu1 %v1232_v2, %s1155_s13  ;;  %s1166_s13 = smov 24  }
  0x85   : > { %v347_v3 = vpop.permute.xlu0 %346  ;;  %v412_v15 = vpop.permute.xlu1 %411 }
  0x86   : > { %v353_v4 = vsel %vm348_vm1, %v347_v3, 0  ;;  %v418_v16 = vsel %vm416_vm2, %v412_v15, 0 }
  0x87   : > { %1043 = vmatpush3.bf16.xpose.msra.mxu0 %v353_v4  ;;  %1049 = vmatpush3.bf16.msra.mxu1 %v418_v16 }
  0x88   : > { %1060 = vmatprep.subr.bf16.mxu0 %v1151_v0  ;;  %1054 = vmatprep.subr.bf16.mxu1 %v1151_v0 }
  0x89   : > { %v464_v23 = vpop.permute.xlu1 %463 }
  0x8a   : > { %v469_v30 = vsel %vm348_vm1, %v464_v23, 0 }
  0x8e   : > { %1045 = vmatmul.mubr.msk.bf16.vlgmr.msra.gmra.mrb[0].mxu0 %vm348_vm1, %v333_v1 }
  0x8f   : > { %1062 = vmatprep.mubr.msk.bf16.mxu0 %vm1152_vm0, %v1151_v0 }
 0x161   : > { %v389_v8 = vpop.f32.mrb[0].mxu0 }
 0x162   : > { %v395_v9 = vmul.f32 0.35355338, %v389_v8  ;;  %v1046_v10 = vpop.f32.mrb[1].mxu0 }
 0x163   : > { %v392_v11 = vpop.f32.mrb[2].mxu0 }
 0x164   : > { %v1047_v12 = vpop.f32.mrb[3].mxu0  ;;  %v396_v13 = vadd.f32 %v395_v9, %v1249_v7 }
 0x166   : > { %v397_v14 = vsel %vm348_vm1, %v396_v13, -inf }
 0x167   : > { %398 = vmax.xlane.f32.xlu0 %v397_v14 }
 0x17d   : > { %703 = vrot.lane.b32.xlu0 %v1232_v2, %s1156_s19 }
 0x1f4   : > { %v399_v17 = vpop.xlane.xlu0 %398 }
 0x1f5   : > { %v400_v18 = vmax.f32 %v399_v17, -1e+30 }
 0x1f7   : > { %v401_v19 = vsub.f32 %v396_v13, %v400_v18 }
 0x1f8   : > { %v704_v33 = vpop.permute.xlu0 %703 }
 0x1f9   : > { %v402_v20 = vmul.f32 1.442695, %v401_v19  ;;  %v709_v35 = vsel %vm348_vm1, %v704_v33, 0 }
 0x1fb   : > { %1125 = vpow2.f32 %v402_v20 }
 0x205   : > { %v1126_v21 = vpop.eup %1125 }
 0x206   : > { %v404_v22 = vsel %vm348_vm1, %v1126_v21, 0.0 }
 0x207   : > { %405 = vadd.xlane.f32.xlu1 %v404_v22 }
 0x218   : > { %461 = vrot.lane.b32.xlu1 %v1232_v2, %s1157_s20 }
 0x21c   : > { %583 = vrot.lane.b32.xlu1 %v1232_v2, %s1158_s21 }
 0x220   : > { %581 = vrot.lane.b32.xlu1 %v1232_v2, %s1159_s22 }
 0x224   : > { %701 = vrot.lane.b32.xlu1 %v1232_v2, %s1160_s23 }
 0x294   : > { %v406_v24 = vpop.xlane.xlu1 %405 }
 0x295   : > { %v407_v25 = vmax.f32 %v406_v24, 1e-30 }
 0x297   : > { %1127 = vrcp.f32 %v407_v25 }
 0x298   : > { %v462_v28 = vpop.permute.xlu1 %461 }
 0x29c   : > { %v584_v31 = vpop.permute.xlu1 %583 }
 0x29d   : > { %v589_v32 = vsel %vm348_vm1, %v584_v31, 0 }
 0x2a0   : > { %v582_v34 = vpop.permute.xlu1 %581 }
 0x2a1   : > { %v1128_v26 = vpop.eup %1127 }
 0x2a2   : > { %v409_v27 = vmul.f32 %v1128_v26, %v1126_v21 }
 0x2a4   : > { %v410_v29 = vpack.c.bf16 %v409_v27, %v409_v27  ;;  %v702_v36 = vpop.permute.xlu1 %701 }
 0x2a6   : > { %1051 = vmatmul.mubr.msk.bf16.vlgmr.msra.gmra.mrb[0].mxu1 %vm348_vm1, %v410_v29 }
 0x2a7   : > { %1055 = vmatpush3.bf16.xpose.msra.mxu1 %v469_v30  ;;  %1056 = vmatprep.mubr.msk.bf16.mxu1 %vm1152_vm0, %v1151_v0 }
 0x2a8   : > { %1066 = vmatprep.subr.bf16.mxu1 %v1151_v0 }
 0x2ae   : > { %1057 = vmatmul.mubr.msk.bf16.vlgmr.msra.gmra.mrb[4].mxu1 %vm348_vm1, %v462_v28 }
 0x2af   : > { %1067 = vmatpush3.bf16.xpose.msra.mxu1 %v589_v32  ;;  %1068 = vmatprep.mubr.msk.bf16.mxu1 %vm1152_vm0, %v1151_v0 }
 0x2b0   : > { %1078 = vmatprep.subr.bf16.mxu1 %v1151_v0 }
 0x2b6   : > { %1069 = vmatmul.mubr.msk.bf16.vlgmr.msra.gmra.mrb[8].mxu1 %vm348_vm1, %v582_v34 }
 0x2b7   : > { %1079 = vmatpush3.bf16.xpose.msra.mxu1 %v709_v35  ;;  %1080 = vmatprep.mubr.msk.bf16.mxu1 %vm1152_vm0, %v1151_v0 }
 0x2b8   : > { %1090 = vmatprep.subr.bf16.mxu1 %v1151_v0 }
 0x2be   : > { %1081 = vmatmul.mubr.msk.bf16.vlgmr.msra.gmra.mrb[12].mxu1 %vm348_vm1, %v702_v36 }
 0x2bf   : > { %1094 = vmatprep.mubr.msk.bf16.mxu1 %vm1152_vm0, %v1151_v0 }
 0x379   : > { %v454_v37 = vpop.f32.mrb[0].mxu1 }
 0x37a   : > { %460 = vst.msk [vmem:[#allocation2] sm:$0xff] %vm348_vm1, %v454_v37  ;;  %v1052_v38 = vpop.f32.mrb[1].mxu1 }
 0x37b   : > { %v457_v39 = vpop.f32.mrb[2].mxu1 }
 0x37c   : > { %v1053_v40 = vpop.f32.mrb[3].mxu1 }
 0x381   : > { %v505_v41 = vpop.f32.mrb[4].mxu1 }
 0x382   : > { %v511_v42 = vmul.f32 0.35355338, %v505_v41  ;;  %v1058_v43 = vpop.f32.mrb[5].mxu1 }
 0x383   : > { %v508_v44 = vpop.f32.mrb[6].mxu1  ;;  %v1124_v43 = vld [vmem:[%s1338_s4 + $0x8] sm:$0xff]  }
 0x384   : > { %v1059_v45 = vpop.f32.mrb[7].mxu1  ;;  %v512_v46 = vadd.f32 %v511_v42, %v1249_v7  ;;  %v1123_v42 = vld [vmem:[%s1338_s4] sm:$0xff]  }
 0x385   : > { %1091 = vmatpush3.bf16.msra.mxu1 %v1123_v42 }
 0x386   : > { %v513_v47 = vsel %vm348_vm1, %v512_v46, -inf  ;;  %1092 = vmatprep.subr.bf16.mxu1 %v1151_v0 }
 0x387   : > { %514 = vmax.xlane.f32.xlu1 %v513_v47 }
 0x389   : > { %v625_v48 = vpop.f32.mrb[8].mxu1  ;;  %1093 = vmatpush3.bf16.msra.mxu1 %v1124_v43 }
 0x38a   : > { %v631_v49 = vmul.f32 0.35355338, %v625_v48  ;;  %v1070_v50 = vpop.f32.mrb[9].mxu1 }
 0x38b   : > { %v628_v51 = vpop.f32.mrb[10].mxu1 }
 0x38c   : > { %v632_v52 = vadd.f32 %v631_v49, %v1249_v7  ;;  %v1071_v53 = vpop.f32.mrb[11].mxu1 }
 0x38e   : > { %v633_v54 = vsel %vm348_vm1, %v632_v52, -inf }
 0x38f   : > { %634 = vmax.xlane.f32.xlu0 %v633_v54 }
 0x391   : > { %v745_v55 = vpop.f32.mrb[12].mxu1 }
 0x392   : > { %v751_v56 = vmul.f32 0.35355338, %v745_v55  ;;  %v1082_v57 = vpop.f32.mrb[13].mxu1 }
 0x393   : > { %v748_v58 = vpop.f32.mrb[14].mxu1 }
 0x394   : > { %v752_v59 = vadd.f32 %v751_v56, %v1249_v7  ;;  %v1083_v60 = vpop.f32.mrb[15].mxu1  ;;  %v1015_v56 = vld [vmem:[%s1339_s5] ss:$0 sm:$0xff] }
 0x395   : > { %v890_v58 = vld [vmem:[%s327_s17] sm:$0xff] }
 0x396   : > { %v753_v61 = vsel %vm348_vm1, %v752_v59, -inf }
 0x397   : > { %754 = vmax.xlane.f32.xlu1 %v753_v61 }
 0x414   : > { %v515_v62 = vpop.xlane.xlu1 %514 }
 0x415   : > { %v516_v63 = vmax.f32 %v515_v62, -1e+30 }
 0x417   : > { %v517_v1 = vsub.f32 %v512_v46, %v516_v63 }
 0x419   : > { %v518_v3 = vmul.f32 1.442695, %v517_v1 }
 0x41b   : > { %1129 = vpow2.f32 %v518_v3 }
 0x41c   : > { %v635_v12 = vpop.xlane.xlu0 %634 }
 0x41d   : > { %v636_v13 = vmax.f32 %v635_v12, -1e+30  ;;  %v1019_v12 = vld [vmem:[%s1340_s6] ss:$0 sm:$0xff] }
 0x41f   : > { %v637_v14 = vsub.f32 %v632_v52, %v636_v13 }
 0x421   : > { %v638_v15 = vmul.f32 1.442695, %v637_v14  ;;  %v1020_v14 = vld [vmem:[%s1341_s7] ss:$0 sm:$0xff] }
 0x424   : > { %v755_v4 = vpop.xlane.xlu1 %754 }
 0x425   : > { %v1130_v5 = vpop.eup %1129  ;;  %v756_v6 = vmax.f32 %v755_v4, -1e+30 }
 0x426   : > { %v520_v8 = vsel %vm348_vm1, %v1130_v5, 0.0 }
 0x427   : > { %v757_v9 = vsub.f32 %v752_v59, %v756_v6  ;;  %521 = vadd.xlane.f32.xlu1 %v520_v8 }
 0x429   : > { %v758_v10 = vmul.f32 1.442695, %v757_v9 }
 0x42b   : > { %1131 = vpow2.f32 %v758_v10 }
 0x42c   : > { %1133 = vpow2.f32 %v638_v15 }
 0x435   : > { %v1132_v11 = vpop.eup %1131 }
 0x436   : > { %v760_v7 = vsel %vm348_vm1, %v1132_v11, 0.0  ;;  %v1134_v16 = vpop.eup %1133 }
 0x437   : > { %761 = vadd.xlane.f32.xlu0 %v760_v7  ;;  %v640_v17 = vsel %vm348_vm1, %v1134_v16, 0.0 }
 0x438   : > { %527 = vrot.lane.b32.xlu1 %v1232_v2, %s1161_s24 }
 0x44d   : > { %647 = vrot.lane.b32.xlu0 %v1232_v2, %s1162_s25  ;;  %s331_s25 = scalar_lea.vmem %s1342_s8, %s1003_s14 }
 0x45c   : > { %641 = vadd.xlane.f32.xlu1 %v640_v17 }
 0x46d   : > { %767 = vrot.lane.b32.xlu1 %v1232_v2, %s1163_s26 }
 0x4b4   : > { %v522_v18 = vpop.xlane.xlu1 %521 }
 0x4b5   : > { %v523_v19 = vmax.f32 %v522_v18, 1e-30 }
 0x4b7   : > { %1135 = vrcp.f32 %v523_v19 }
 0x4b8   : > { %v528_v20 = vpop.permute.xlu1 %527 }
 0x4b9   : > { %v533_v21 = vsel %vm416_vm2, %v528_v20, 0 }
 0x4ba   : > { %1061 = vmatpush3.bf16.msra.mxu0 %v533_v21 }
 0x4bb   : > { %1072 = vmatprep.subr.bf16.mxu0 %v1151_v0 }
 0x4c1   : > { %v1136_v22 = vpop.eup %1135 }
 0x4c2   : > { %v525_v23 = vmul.f32 %v1136_v22, %v1130_v5 }
 0x4c4   : > { %v762_v24 = vpop.xlane.xlu0 %761  ;;  %v526_v25 = vpack.c.bf16 %v525_v23, %v525_v23 }
 0x4c5   : > { %v763_v29 = vmax.f32 %v762_v24, 1e-30 }
 0x4c6   : > { %1063 = vmatmul.mubr.msk.bf16.vlgmr.msra.gmra.mrb[4].mxu0 %vm348_vm1, %v526_v25 }
 0x4c7   : > { %1074 = vmatprep.mubr.msk.bf16.mxu0 %vm1152_vm0, %v1151_v0 }
 0x4c8   : > { %v648_v26 = vpop.permute.xlu0 %647 }
 0x4c9   : > { %v653_v2 = vsel %vm416_vm2, %v648_v26, 0 }
 0x4ca   : > { %1073 = vmatpush3.bf16.msra.mxu0 %v653_v2 }
 0x4cb   : > { %1084 = vmatprep.subr.bf16.mxu0 %v1151_v0 }
 0x4e9   : > { %v642_v27 = vpop.xlane.xlu1 %641 }
 0x4ea   : > { %v643_v28 = vmax.f32 %v642_v27, 1e-30 }
 0x4ec   : > { %1137 = vrcp.f32 %v643_v28 }
 0x4ed   : > { %1139 = vrcp.f32 %v763_v29  ;;  %v768_v31 = vpop.permute.xlu1 %767 }
 0x4ee   : > { %v773_v33 = vsel %vm416_vm2, %v768_v31, 0 }
 0x4f6   : > { %v1138_v30 = vpop.eup %1137 }
 0x4f7   : > { %v645_v32 = vmul.f32 %v1138_v30, %v1134_v16  ;;  %v1140_v35 = vpop.eup %1139 }
 0x4f8   : > { %v765_v36 = vmul.f32 %v1140_v35, %v1132_v11 }
 0x4f9   : > { %v646_v34 = vpack.c.bf16 %v645_v32, %v645_v32 }
 0x4fa   : > { %v766_v37 = vpack.c.bf16 %v765_v36, %v765_v36 }
 0x4fb   : > { %1075 = vmatmul.mubr.msk.bf16.vlgmr.msra.gmra.mrb[8].mxu0 %vm348_vm1, %v646_v34 }
 0x4fc   : > { %1085 = vmatpush3.bf16.msra.mxu0 %v773_v33  ;;  %1086 = vmatprep.mubr.msk.bf16.mxu0 %vm1152_vm0, %v1151_v0 }
 0x503   : > { %1087 = vmatmul.mubr.msk.bf16.vlgmr.msra.gmra.mrb[12].mxu0 %vm348_vm1, %v766_v37 }
 0x599   : > { %v569_v38 = vpop.f32.mrb[4].mxu0 }
 0x59a   : > { %576 = vrot.lane.b32.xlu1 %v569_v38, %s1164_s29  ;;  %v1064_v39 = vpop.f32.mrb[5].mxu0 }
 0x59b   : > { %v572_v40 = vpop.f32.mrb[6].mxu0 }
 0x59c   : > { %v1065_v41 = vpop.f32.mrb[7].mxu0 }
 0x5ce   : > { %v689_v44 = vpop.f32.mrb[8].mxu0 }
 0x5cf   : > { %696 = vrot.lane.b32.xlu0 %v689_v44, %s1165_s12  ;;  %v1076_v45 = vpop.f32.mrb[9].mxu0 }
 0x5d0   : > { %v692_v46 = vpop.f32.mrb[10].mxu0 }
 0x5d1   : > { %v1077_v47 = vpop.f32.mrb[11].mxu0 }
 0x5d6   : > { %v809_v48 = vpop.f32.mrb[12].mxu0 }
 0x5d7   : > { %816 = vrot.lane.b32.xlu1 %v809_v48, %s1166_s13  ;;  %v1088_v49 = vpop.f32.mrb[13].mxu0 }
 0x5d8   : > { %v812_v50 = vpop.f32.mrb[14].mxu0 }
 0x5d9   : > { %v1089_v51 = vpop.f32.mrb[15].mxu0 }
 0x60c   : > { %v577_v52 = vpop.permute.xlu1 %576 }
 0x60d   : > { %580 = vst.msk [vmem:[#allocation2] sm:$0xff] %vm579_vm3, %v577_v52 }
 0x641   : > { %v697_v53 = vpop.permute.xlu0 %696 }
 0x642   : > { %700 = vst.msk [vmem:[#allocation2] sm:$0xff] %vm699_vm4, %v697_v53 }
 0x649   : > { %v817_v0 = vpop.permute.xlu1 %816 }
 0x64a   : > { %820 = vst.msk [vmem:[#allocation2] sm:$0xff] %vm819_vm5, %v817_v0 }
 0x651   : > { %v821_v54 = vld [vmem:[#allocation2] sm:$0xff] }
 0x652   : > { %v822_v55 = vpack.c.bf16 %v821_v54, %v821_v54 }
 0x654   : > { %1095 = vmatmul.mubr.msk.bf16.vlgmr.msra.gmra.mrb[16].mxu1 %vm846_vm6, %v822_v55 }
 0x727   : > { %v884_v57 = vpop.f32.mrb[16].mxu1 }
 0x728   : > { %v885_v59 = vadd.f32 %v1015_v56, %v884_v57  ;;  %v1096_v60 = vpop.f32.mrb[17].mxu1 }
 0x729   : > { %v887_v61 = vpop.f32.mrb[18].mxu1 }
 0x72a   : > { %v1097_v62 = vpop.f32.mrb[19].mxu1  ;;  %v891_v63 = vadd.f32 %v890_v58, %v885_v59 }
 0x72c   : > { %v892_v1 = vsel %vm846_vm6, %v891_v63, 0.0 }
 0x72d   : > { %893 = vadd.xlane.f32.xlu0 %v892_v1 }
 0x7ba   : > { %v894_v3 = vpop.xlane.xlu0 %893 }
 0x7bb   : > { %v896_v4 = vmul.f32 0.03125, %v894_v3 }
 0x7bd   : > { %v897_v5 = vsub.f32 %v891_v63, %v896_v4 }
 0x7bf   : > { %v898_v6 = vmul.f32 %v897_v5, %v897_v5 }
 0x7c1   : > { %v899_v8 = vsel %vm846_vm6, %v898_v6, 0.0 }
 0x7c2   : > { %900 = vadd.xlane.f32.xlu1 %v899_v8 }
 0x84f   : > { %v901_v9 = vpop.xlane.xlu1 %900 }
 0x850   : > { %v902_v10 = vmul.f32 0.03125, %v901_v9 }
 0x852   : > { %v903_v11 = vadd.f32 1e-05, %v902_v10 }
 0x854   : > { %1141 = vrsqrt.f32 %v903_v11 }
 0x85e   : > { %v1142_v7 = vpop.eup %1141 }
 0x85f   : > { %v905_v13 = vmul.f32 %v1142_v7, %v897_v5 }
 0x861   : > { %v913_v15 = vmul.f32 %v1019_v12, %v905_v13 }
 0x863   : > { %v921_v16 = vadd.f32 %v1020_v14, %v913_v15 }
 0x865   : > { %922 = vst.msk [vmem:[%s331_s25] sm:$0xff] %vm846_vm6, %v921_v16 }
 0x866 PF: > { %s18_s27 = sadd.s32 1, %s1149_s27  }
 0x867   : > { %p15_p4 = scmp.ge.s32.totalorder %s18_s27, 4  }
 0x869   :  { %17 = sbr.rel (!%p15_p4) target bundleno = 1 (0x1), region = 88 }

// kernel: text_decode_forward.18
= control target key start
LH: loop header
LB: loop body
LE: loop exit
PB: predicated region body
PF: predicated region fallthrough
CT: control target
= control target key end

     0   :  { %v290_v0 = vmov 0.0   ;;  %vm291_vm0 = vmmov 0   ;;  %vm53_vm1 = vcmask 261120   ;;  %vm140_vm2 = vcmask 523264   ;;  %s381_s1 = inlined_call_operand.vmem [shape: bf16[32,64], index: 1, kind: input, shape index: {}]   ;;  %s382_s0 = inlined_call_operand.vmem [shape: f32[16,32], index: 0, kind: input, shape index: {}]   ;;  %s383_s3 = inlined_call_operand.vmem [shape: bf16[64,32], index: 3, kind: input, shape index: {}]   ;;  %s384_s2 = inlined_call_operand.vmem [shape: f32[1,64], index: 2, kind: input, shape index: {}]   ;;  %s385_s4 = inlined_call_operand.vmem [shape: f32[1,32], index: 4, kind: input, shape index: {}]   ;;  %s386_s5 = inlined_call_operand.vmem [shape: f32[1,32], index: 5, kind: input, shape index: {}]   ;;  %s387_s6 = inlined_call_operand.vmem [shape: f32[1,32], index: 6, kind: input, shape index: {}]   ;;  %s388_s7 = inlined_call_operand.vmem [shape: f32[16,32], index: 7, kind: output, shape index: {}]  }
   0x1   :  { %258 = vmatprep.subr.bf16.mxu0 %v290_v0  ;;  %v280_v1 = vld [vmem:[%s381_s1] sm:$0xff]   ;;  %262 = vmatprep.mubr.msk.bf16.mxu0 %vm291_vm0, %v290_v0  ;;  %v281_v2 = vld [vmem:[%s381_s1 + $0x8] sm:$0xff]   ;;  %v284_v8 = vld [vmem:[%s383_s3 + $0x10] sm:$0xff]  }
   0x2   :  { %266 = vmatprep.subr.bf16.mxu1 %v290_v0  ;;  %274 = vmatprep.mubr.msk.bf16.mxu1 %vm291_vm0, %v290_v0  ;;  %v27_v3 = vld [vmem:[%s382_s0] sm:$0xff]  ;;  %v28_v4 = vld [vmem:[%s382_s0 + $0x8] sm:$0xff]  ;;  %v285_v9 = vld [vmem:[%s383_s3 + $0x18] sm:$0xff]  }
   0x3   :  { %259 = vmatpush3.bf16.msra.mxu0 %v280_v1  ;;  %v282_v5 = vld [vmem:[%s383_s3] sm:$0xff]   ;;  %v283_v6 = vld [vmem:[%s383_s3 + $0x8] sm:$0xff]   ;;  %v29_v7 = vpack.c.bf16 %v28_v4, %v27_v3 }
   0x4   :  { %260 = vmatprep.subr.bf16.mxu0 %v290_v0  ;;  %267 = vmatpush3.bf16.msra.mxu1 %v282_v5  ;;  %v238_v10 = vld [vmem:[%s384_s2] ss:$0 sm:$0xff] }
   0x5   :  { %268 = vmatprep.subr.bf16.mxu1 %v290_v0  ;;  %v242_v20 = vld [vmem:[%s385_s4] ss:$0 sm:$0xff] }
   0x6   :  { %v248_v48 = vld [vmem:[%s386_s5] ss:$0 sm:$0xff] }
   0x7   :  { %261 = vmatpush3.bf16.msra.mxu0 %v281_v2  ;;  %v249_v50 = vld [vmem:[%s387_s6] ss:$0 sm:$0xff] }
   0x8   :  { %269 = vmatpush3.bf16.msra.mxu1 %v283_v6 }
   0x9   :  { %270 = vmatprep.subr.bf16.mxu1 %v290_v0 }
   0xa   :  { %263 = vmatmul.mubr.msk.bf16.vlgmr.msra.gmra.mrb[0].mxu0 %vm53_vm1, %v29_v7 }
   0xc   :  { %271 = vmatpush3.bf16.msra.mxu1 %v284_v8 }
   0xd   :  { %272 = vmatprep.subr.bf16.mxu1 %v290_v0 }
  0x10   :  { %273 = vmatpush3.bf16.msra.mxu1 %v285_v9 }
  0xdd   :  { %v91_v11 = vpop.f32.mrb[0].mxu0 }
  0xde   :  { %v92_v12 = vadd.f32 %v238_v10, %v91_v11  ;;  %v264_v13 = vpop.f32.mrb[1].mxu0 }
  0xdf   :  { %v94_v14 = vpop.f32.mrb[2].mxu0 }
  0xe0   :  { %v95_v15 = vadd.f32 %v238_v10, %v94_v14  ;;  %v265_v16 = vpop.f32.mrb[3].mxu0  ;;  %v98_v17 = vmax.f32 %v92_v12, 0.0 }
  0xe2   :  { %v99_v18 = vmax.f32 %v95_v15, 0.0 }
  0xe4   :  { %v100_v19 = vpack.c.bf16 %v99_v18, %v98_v17 }
  0xe6   :  { %275 = vmatmul.mubr.msk.bf16.vlgmr.msra.gmra.mrb[0].mxu1 %vm140_vm2, %v100_v19 }
 0x1b9   :  { %v178_v21 = vpop.f32.mrb[0].mxu1 }
 0x1ba   :  { %v179_v22 = vadd.f32 %v242_v20, %v178_v21  ;;  %v276_v23 = vpop.f32.mrb[1].mxu1 }
 0x1bb   :  { %v181_v24 = vpop.f32.mrb[2].mxu1 }
 0x1bc   :  { %v182_v25 = vadd.f32 %v242_v20, %v181_v24  ;;  %v277_v26 = vpop.f32.mrb[3].mxu1  ;;  %v185_v27 = vadd.f32 %v179_v22, %v27_v3 }
 0x1be   :  { %v187_v28 = vsel %vm53_vm1, %v185_v27, 0.0  ;;  %v186_v29 = vadd.f32 %v182_v25, %v28_v4 }
 0x1bf   :  { %188 = vadd.xlane.f32.xlu0 %v187_v28 }
 0x1c0   :  { %v190_v30 = vsel %vm53_vm1, %v186_v29, 0.0 }
 0x1c3   :  { %191 = vadd.xlane.f32.xlu0 %v190_v30 }
 0x24c   :  { %v189_v31 = vpop.xlane.xlu0 %188 }
 0x24d   :  { %v194_v32 = vmul.f32 0.03125, %v189_v31 }
 0x24f   :  { %v196_v33 = vsub.f32 %v185_v27, %v194_v32 }
 0x250   :  { %v192_v34 = vpop.xlane.xlu0 %191 }
 0x251   :  { %v195_v35 = vmul.f32 0.03125, %v192_v34  ;;  %v198_v36 = vmul.f32 %v196_v33, %v196_v33 }
 0x253   :  { %v197_v37 = vsub.f32 %v186_v29, %v195_v35  ;;  %v200_v38 = vsel %vm53_vm1, %v198_v36, 0.0 }
 0x254   :  { %201 = vadd.xlane.f32.xlu1 %v200_v38 }
 0x255   :  { %v199_v39 = vmul.f32 %v197_v37, %v197_v37 }
 0x257   :  { %v203_v40 = vsel %vm53_vm1, %v199_v39, 0.0 }
 0x258   :  { %204 = vadd.xlane.f32.xlu1 %v203_v40 }
 0x2e1   :  { %v202_v41 = vpop.xlane.xlu1 %201 }
 0x2e2   :  { %v206_v42 = vmul.f32 0.03125, %v202_v41 }
 0x2e4   :  { %v208_v43 = vadd.f32 1e-05, %v206_v42 }
 0x2e5   :  { %v205_v44 = vpop.xlane.xlu1 %204 }
 0x2e6   :  { %286 = vrsqrt.f32 %v208_v43  ;;  %v207_v45 = vmul.f32 0.03125, %v205_v44 }
 0x2e8   :  { %v209_v46 = vadd.f32 1e-05, %v207_v45 }
 0x2ea   :  { %288 = vrsqrt.f32 %v209_v46 }
 0x2f0   :  { %v287_v47 = vpop.eup %286 }
 0x2f1   :  { %v212_v49 = vmul.f32 %v287_v47, %v196_v33 }
 0x2f3   :  { %v221_v51 = vmul.f32 %v248_v48, %v212_v49 }
 0x2f4   :  { %v289_v52 = vpop.eup %288 }
 0x2f5   :  { %v230_v53 = vadd.f32 %v249_v50, %v221_v51  ;;  %v213_v54 = vmul.f32 %v289_v52, %v197_v37 }
 0x2f7   :  { %232 = vst.msk [vmem:[%s388_s7] sm:$0xff] %vm53_vm1, %v230_v53  ;;  %v222_v55 = vmul.f32 %v248_v48, %v213_v54 }
 0x2f9   :  { %v231_v56 = vadd.f32 %v249_v50, %v222_v55 }
 0x2fb   :  { %233 = vst.msk [vmem:[%s388_s7 + $0x8] sm:$0xff] %vm53_vm1, %v231_v56 }

// kernel: text_decode_forward.17
= control target key start
LH: loop header
LB: loop body
LE: loop exit
PB: predicated region body
PF: predicated region fallthrough
CT: control target
= control target key end

     0   :  { %s1245_s27 = smov 0   ;;  %s1364_s0 = inlined_call_operand.vmem [shape: bf16[2,8,32], index: 0, kind: input, shape index: {}]   ;;  %s1365_s1 = inlined_call_operand.vmem [shape: bf16[2,10,64], index: 1, kind: input, shape index: {}]   ;;  %s1366_s2 = inlined_call_operand.vmem [shape: f32[2,1,10], index: 2, kind: input, shape index: {}]   ;;  %s1367_s3 = inlined_call_operand.vmem [shape: f32[2,8,32], index: 3, kind: input, shape index: {}]   ;;  %s1368_s4 = inlined_call_operand.vmem [shape: bf16[32,32], index: 4, kind: input, shape index: {}]   ;;  %s1369_s5 = inlined_call_operand.vmem [shape: f32[1,32], index: 5, kind: input, shape index: {}]   ;;  %s1370_s6 = inlined_call_operand.vmem [shape: f32[1,32], index: 6, kind: input, shape index: {}]   ;;  %s1371_s7 = inlined_call_operand.vmem [shape: f32[1,32], index: 7, kind: input, shape index: {}]   ;;  %s1372_s8 = inlined_call_operand.vmem [shape: f32[2,8,32], index: 8, kind: output, shape index: {}]  }
   0x1 LB: > { %s1033_s28 = sadd.s32 4294967295, %s1186_s27   ;;  %p1037_p0 = scmp.ge.s32.totalorder %s1186_s27, 1  ;;  %s1186_s27 = sphi %s1245_s27, %s18_s27  }
   0x2   : > { %p288_p1 = scmp.lt.s32.totalorder %s1186_s27, 3 }
   0x4   : > { %p289_p2 = pnand %p1037_p0, %p288_p1 }
   0x5   : > { %p332_p3 = scmp.lt.s32.totalorder (!%p289_p2), %s1033_s28, 1  ;;  %v1188_v0 = vmov (!%p289_p2), 0.0   ;;  %vm1189_vm0 = vmmov (!%p289_p2), 0   ;;  %vm362_vm1 = vcmask (!%p289_p2), 64512   ;;  %vm417_vm2 = vcmask (!%p289_p2), 80896   ;;  %s1190_s18 = smov (!%p289_p2), 96  }
   0x6   : > { %292 = sbr.rel (%p289_p2) target bundleno = 1988 (0x7c4), region = 52  ;;  %1082 = vmatprep.subr.bf16.mxu0 (!%p289_p2), %v1188_v0  ;;  %1084 = vmatprep.mubr.msk.bf16.mxu0 (!%p289_p2), %vm1189_vm0, %v1188_v0  ;;  %s1191_s19 = smov (!%p289_p2), 120   ;;  %vm437_vm3 = vcmask (!%p289_p2), 1044480   ;;  %vm603_vm4 = vcmask (!%p289_p2), 130112   ;;  %vm723_vm5 = vcmask (!%p289_p2), 195712   ;;  %vm843_vm6 = vcmask (!%p289_p2), 261312  }
   0x7   : > { %1088 = vmatprep.subr.bf16.mxu1 (!%p289_p2), %v1188_v0  ;;  %1090 = vmatprep.mubr.msk.bf16.mxu1 (!%p289_p2), %vm1189_vm0, %v1188_v0  ;;  %s1192_s20 = smov (!%p289_p2), 112   ;;  %s1193_s21 = smov (!%p289_p2), 104   ;;  %vm870_vm7 = vcmask (!%p289_p2), 261120  }
   0x8   : > { %s1194_s22 = smov (!%p289_p2), 88   ;;  %s1195_s23 = smov (!%p289_p2), 72  }
   0x9   : > { %s1196_s24 = smov (!%p289_p2), 80   ;;  %s1197_s25 = smov (!%p289_p2), 8  }
   0xd   : > { %s1374_s28 = smov (!%p332_p3, %s1033_s28), 1 }
   0xe   : > { %s1259_s29 = sshll.u32 %s1374_s28, 3  ;;  %s1038_s11 = sshll.u32 %s1374_s28, 2 }
   0xf   : > { %s340_s10 = scalar_lea.vmem %s1365_s1, %s1259_s29  ;;  %s335_s14 = scalar_lea.vmem %s1364_s0, %s1038_s11 }
  0x10   : > { %v1265_v1 = vld [vmem:[%s340_s10] sm:$0x1f]   ;;  %s343_s17 = scalar_lea.vmem %s1366_s2, %s1374_s28  ;;  %s1198_s10 = smov 16  }
  0x11   : > { %v367_v2 = vsel %vm362_vm1, %v1265_v1, 0  ;;  %v353_v3 = vld [vmem:[%s335_s14] sm:$0xf]  ;;  %432 = vrot.lane.b32.xlu1 %v1265_v1, %s1190_s18  ;;  %s1199_s11 = smov 24   ;;  %s347_s14 = scalar_lea.vmem %s1367_s3, %s1259_s29 }
  0x12   : > { %1083 = vmatpush3.bf16.xpose.msra.mxu0 %v367_v2  ;;  %v1279_v5 = vld [vmem:[%s343_s17] ss:$0 sm:$0xff]  ;;  %v1047_v12 = vcombine.low %v353_v3, %v353_v3 }
  0x13   : > { %1100 = vmatprep.subr.bf16.mxu0 %v1188_v0 }
  0x15   : > { %487 = vrot.lane.b32.xlu1 %v1265_v1, %s1191_s19 }
  0x19   : > { %1085 = vmatmul.mubr.msk.bf16.vlgmr.msra.gmra.mrb[0].mxu0 %vm362_vm1, %v353_v3  ;;  %607 = vrot.lane.b32.xlu1 %v1265_v1, %s1192_s20 }
  0x1a   : > { %1102 = vmatprep.mubr.msk.bf16.mxu0 %vm1189_vm0, %v1188_v0 }
  0x1d   : > { %605 = vrot.lane.b32.xlu1 %v1047_v12, %s1192_s20 }
  0x21   : > { %727 = vrot.lane.b32.xlu1 %v1265_v1, %s1193_s21 }
  0x25   : > { %725 = vrot.lane.b32.xlu1 %v1047_v12, %s1193_s21 }
  0x83   : > { %v433_v19 = vpop.permute.xlu1 %432 }
  0x84   : > { %v439_v20 = vsel %vm437_vm3, %v433_v19, 0 }
  0x85   : > { %1089 = vmatpush3.bf16.msra.mxu1 %v439_v20 }
  0x86   : > { %1094 = vmatprep.subr.bf16.mxu1 %v1188_v0 }
  0x87   : > { %v488_v24 = vpop.permute.xlu1 %487 }
  0x88   : > { %v493_v26 = vsel %vm362_vm1, %v488_v24, 0 }
  0x8b   : > { %v608_v28 = vpop.permute.xlu1 %607 }
  0x8c   : > { %v613_v31 = vsel %vm362_vm1, %v608_v28, 0 }
  0x8f   : > { %v606_v30 = vpop.permute.xlu1 %605 }
  0x93   : > { %v728_v32 = vpop.permute.xlu1 %727 }
  0x94   : > { %v733_v33 = vsel %vm362_vm1, %v728_v32, 0 }
  0x97   : > { %v726_v34 = vpop.permute.xlu1 %725 }
  0xec   : > { %v403_v4 = vpop.f32.mrb[0].mxu0 }
  0xed   : > { %v409_v6 = vmul.f32 0.35355338, %v403_v4  ;;  %v1086_v7 = vpop.f32.mrb[1].mxu0 }
  0xee   : > { %v406_v8 = vpop.f32.mrb[2].mxu0 }
  0xef   : > { %v1087_v9 = vpop.f32.mrb[3].mxu0  ;;  %v416_v10 = vadd.f32 %v1279_v5, %v409_v6 }
  0xf1   : > { %v418_v11 = vsel %vm417_vm2, %v416_v10, -inf }
  0xf2   : > { %419 = vmax.xlane.f32.xlu0 %v418_v11 }
 0x17f   : > { %v420_v13 = vpop.xlane.xlu0 %419 }
 0x180   : > { %v421_v14 = vmax.f32 %v420_v13, -1e+30 }
 0x182   : > { %v422_v15 = vsub.f32 %v416_v10, %v421_v14 }
 0x184   : > { %v423_v16 = vmul.f32 1.442695, %v422_v15 }
 0x186   : > { %1162 = vpow2.f32 %v423_v16 }
 0x190   : > { %v1163_v17 = vpop.eup %1162 }
 0x191   : > { %v425_v18 = vsel %vm417_vm2, %v1163_v17, 0.0 }
 0x192   : > { %426 = vadd.xlane.f32.xlu0 %v425_v18 }
 0x1a8   : > { %485 = vrot.lane.b32.xlu0 %v1047_v12, %s1191_s19 }
 0x21f   : > { %v427_v21 = vpop.xlane.xlu0 %426 }
 0x220   : > { %v428_v22 = vmax.f32 %v427_v21, 1e-30 }
 0x222   : > { %1164 = vrcp.f32 %v428_v22 }
 0x223   : > { %v486_v29 = vpop.permute.xlu0 %485 }
 0x22c   : > { %v1165_v23 = vpop.eup %1164 }
 0x22d   : > { %v430_v25 = vmul.f32 %v1165_v23, %v1163_v17 }
 0x22f   : > { %v431_v27 = vpack.c.bf16 %v430_v25, %v430_v25 }
 0x231   : > { %1091 = vmatmul.mubr.msk.bf16.vlgmr.msra.gmra.mrb[0].mxu1 %vm417_vm2, %v431_v27 }
 0x232   : > { %1095 = vmatpush3.bf16.xpose.msra.mxu1 %v493_v26  ;;  %1096 = vmatprep.mubr.msk.bf16.mxu1 %vm1189_vm0, %v1188_v0 }
 0x233   : > { %1106 = vmatprep.subr.bf16.mxu1 %v1188_v0 }
 0x239   : > { %1097 = vmatmul.mubr.msk.bf16.vlgmr.msra.gmra.mrb[4].mxu1 %vm362_vm1, %v486_v29 }
 0x23a   : > { %1107 = vmatpush3.bf16.xpose.msra.mxu1 %v613_v31  ;;  %1108 = vmatprep.mubr.msk.bf16.mxu1 %vm1189_vm0, %v1188_v0 }
 0x23b   : > { %1118 = vmatprep.subr.bf16.mxu1 %v1188_v0 }
 0x241   : > { %1109 = vmatmul.mubr.msk.bf16.vlgmr.msra.gmra.mrb[8].mxu1 %vm362_vm1, %v606_v30 }
 0x242   : > { %1119 = vmatpush3.bf16.xpose.msra.mxu1 %v733_v33  ;;  %1120 = vmatprep.mubr.msk.bf16.mxu1 %vm1189_vm0, %v1188_v0 }
 0x243   : > { %1130 = vmatprep.subr.bf16.mxu1 %v1188_v0 }
 0x249   : > { %1121 = vmatmul.mubr.msk.bf16.vlgmr.msra.gmra.mrb[12].mxu1 %vm362_vm1, %v726_v34 }
 0x24a   : > { %1134 = vmatprep.mubr.msk.bf16.mxu1 %vm1189_vm0, %v1188_v0 }
 0x304   : > { %v475_v35 = vpop.f32.mrb[0].mxu1 }
 0x305   : > { %481 = vst.msk [vmem:[#allocation2] sm:$0xff] %vm362_vm1, %v475_v35  ;;  %v1092_v36 = vpop.f32.mrb[1].mxu1 }
 0x306   : > { %v478_v37 = vpop.f32.mrb[2].mxu1 }
 0x307   : > { %v1093_v38 = vpop.f32.mrb[3].mxu1 }
 0x30c   : > { %v529_v39 = vpop.f32.mrb[4].mxu1 }
 0x30d   : > { %v535_v40 = vmul.f32 0.35355338, %v529_v39  ;;  %v1098_v41 = vpop.f32.mrb[5].mxu1 }
 0x30e   : > { %v532_v42 = vpop.f32.mrb[6].mxu1  ;;  %v1161_v41 = vld [vmem:[%s1368_s4 + $0x8] sm:$0xff]  }
 0x30f   : > { %v1099_v43 = vpop.f32.mrb[7].mxu1  ;;  %v536_v44 = vadd.f32 %v1279_v5, %v535_v40  ;;  %v1160_v40 = vld [vmem:[%s1368_s4] sm:$0xff]  }
 0x310   : > { %1131 = vmatpush3.bf16.msra.mxu1 %v1160_v40 }
 0x311   : > { %v537_v45 = vsel %vm417_vm2, %v536_v44, -inf  ;;  %1132 = vmatprep.subr.bf16.mxu1 %v1188_v0 }
 0x312   : > { %538 = vmax.xlane.f32.xlu1 %v537_v45 }
 0x314   : > { %v649_v46 = vpop.f32.mrb[8].mxu1  ;;  %1133 = vmatpush3.bf16.msra.mxu1 %v1161_v41 }
 0x315   : > { %v655_v47 = vmul.f32 0.35355338, %v649_v46  ;;  %v1110_v48 = vpop.f32.mrb[9].mxu1 }
 0x316   : > { %v652_v49 = vpop.f32.mrb[10].mxu1 }
 0x317   : > { %v1111_v50 = vpop.f32.mrb[11].mxu1  ;;  %v656_v51 = vadd.f32 %v1279_v5, %v655_v47 }
 0x319   : > { %v657_v52 = vsel %vm417_vm2, %v656_v51, -inf }
 0x31a   : > { %658 = vmax.xlane.f32.xlu0 %v657_v52 }
 0x31c   : > { %v769_v53 = vpop.f32.mrb[12].mxu1 }
 0x31d   : > { %v775_v54 = vmul.f32 0.35355338, %v769_v53  ;;  %v1122_v55 = vpop.f32.mrb[13].mxu1 }
 0x31e   : > { %v772_v56 = vpop.f32.mrb[14].mxu1 }
 0x31f   : > { %v1123_v57 = vpop.f32.mrb[15].mxu1  ;;  %v776_v58 = vadd.f32 %v1279_v5, %v775_v54  ;;  %v1054_v54 = vld [vmem:[%s1369_s5] ss:$0 sm:$0xff] }
 0x320   : > { %v914_v56 = vld [vmem:[%s347_s14] sm:$0xff] }
 0x321   : > { %v777_v59 = vsel %vm417_vm2, %v776_v58, -inf }
 0x322   : > { %778 = vmax.xlane.f32.xlu1 %v777_v59 }
 0x333   : > { %551 = vrot.lane.b32.xlu1 %v1265_v1, %s1194_s22 }
 0x39f   : > { %v539_v60 = vpop.xlane.xlu1 %538 }
 0x3a0   : > { %v540_v61 = vmax.f32 %v539_v60, -1e+30 }
 0x3a2   : > { %v541_v62 = vsub.f32 %v536_v44, %v540_v61 }
 0x3a4   : > { %v542_v63 = vmul.f32 1.442695, %v541_v62 }
 0x3a6   : > { %1166 = vpow2.f32 %v542_v63 }
 0x3a7   : > { %v659_v2 = vpop.xlane.xlu0 %658 }
 0x3a8   : > { %v660_v3 = vmax.f32 %v659_v2, -1e+30 }
 0x3aa   : > { %v661_v4 = vsub.f32 %v656_v51, %v660_v3 }
 0x3ac   : > { %v662_v6 = vmul.f32 1.442695, %v661_v4 }
 0x3ae   : > { %1168 = vpow2.f32 %v662_v6 }
 0x3af   : > { %v779_v7 = vpop.xlane.xlu1 %778 }
 0x3b0   : > { %v1167_v8 = vpop.eup %1166  ;;  %v780_v9 = vmax.f32 %v779_v7, -1e+30 }
 0x3b1   : > { %v544_v5 = vsel %vm417_vm2, %v1167_v8, 0.0 }
 0x3b2   : > { %v781_v10 = vsub.f32 %v776_v58, %v780_v9  ;;  %545 = vadd.xlane.f32.xlu0 %v544_v5 }
 0x3b3   : > { %v552_v11 = vpop.permute.xlu1 %551 }
 0x3b4   : > { %v782_v12 = vmul.f32 1.442695, %v781_v10  ;;  %v557_v13 = vsel %vm437_vm3, %v552_v11, 0  ;;  %v1058_v10 = vld [vmem:[%s1370_s6] ss:$0 sm:$0xff] }
 0x3b5   : > { %1101 = vmatpush3.bf16.msra.mxu0 %v557_v13 }
 0x3b6   : > { %1170 = vpow2.f32 %v782_v12  ;;  %1112 = vmatprep.subr.bf16.mxu0 %v1188_v0  ;;  %v1059_v12 = vld [vmem:[%s1371_s7] ss:$0 sm:$0xff] }
 0x3b8   : > { %v1169_v14 = vpop.eup %1168 }
 0x3b9   : > { %v664_v15 = vsel %vm417_vm2, %v1169_v14, 0.0 }
 0x3ba   : > { %665 = vadd.xlane.f32.xlu1 %v664_v15 }
 0x3c0   : > { %v1171_v16 = vpop.eup %1170 }
 0x3c1   : > { %v784_v17 = vsel %vm417_vm2, %v1171_v16, 0.0 }
 0x3c2   : > { %785 = vadd.xlane.f32.xlu0 %v784_v17 }
 0x3cb   : > { %791 = vrot.lane.b32.xlu1 %v1265_v1, %s1195_s23  ;;  %s351_s23 = scalar_lea.vmem %s1372_s8, %s1259_s29 }
 0x3d8   : > { %671 = vrot.lane.b32.xlu0 %v1265_v1, %s1196_s24 }
 0x43f   : > { %v546_v18 = vpop.xlane.xlu0 %545 }
 0x440   : > { %v547_v19 = vmax.f32 %v546_v18, 1e-30 }
 0x442   : > { %1172 = vrcp.f32 %v547_v19 }
 0x447   : > { %v666_v20 = vpop.xlane.xlu1 %665 }
 0x448   : > { %v667_v21 = vmax.f32 %v666_v20, 1e-30 }
 0x44a   : > { %1174 = vrcp.f32 %v667_v21 }
 0x44b   : > { %v792_v29 = vpop.permute.xlu1 %791 }
 0x44c   : > { %v1173_v22 = vpop.eup %1172  ;;  %v797_v32 = vsel %vm437_vm3, %v792_v29, 0 }
 0x44d   : > { %v549_v23 = vmul.f32 %v1173_v22, %v1167_v8 }
 0x44f   : > { %v786_v24 = vpop.xlane.xlu0 %785  ;;  %v550_v25 = vpack.c.bf16 %v549_v23, %v549_v23 }
 0x450   : > { %v787_v26 = vmax.f32 %v786_v24, 1e-30 }
 0x451   : > { %1103 = vmatmul.mubr.msk.bf16.vlgmr.msra.gmra.mrb[4].mxu0 %vm417_vm2, %v550_v25 }
 0x452   : > { %1176 = vrcp.f32 %v787_v26  ;;  %1114 = vmatprep.mubr.msk.bf16.mxu0 %vm1189_vm0, %v1188_v0 }
 0x453   : > { %v672_v27 = vpop.permute.xlu0 %671 }
 0x454   : > { %v1175_v28 = vpop.eup %1174  ;;  %v677_v1 = vsel %vm437_vm3, %v672_v27, 0 }
 0x455   : > { %v669_v30 = vmul.f32 %v1175_v28, %v1169_v14  ;;  %1113 = vmatpush3.bf16.msra.mxu0 %v677_v1 }
 0x456   : > { %1124 = vmatprep.subr.bf16.mxu0 %v1188_v0 }
 0x457   : > { %v670_v31 = vpack.c.bf16 %v669_v30, %v669_v30 }
 0x459   : > { %1115 = vmatmul.mubr.msk.bf16.vlgmr.msra.gmra.mrb[8].mxu0 %vm417_vm2, %v670_v31 }
 0x45a   : > { %1125 = vmatpush3.bf16.msra.mxu0 %v797_v32  ;;  %1126 = vmatprep.mubr.msk.bf16.mxu0 %vm1189_vm0, %v1188_v0 }
 0x45c   : > { %v1177_v33 = vpop.eup %1176 }
 0x45d   : > { %v789_v34 = vmul.f32 %v1177_v33, %v1171_v16 }
 0x45f   : > { %v790_v35 = vpack.c.bf16 %v789_v34, %v789_v34 }
 0x461   : > { %1127 = vmatmul.mubr.msk.bf16.vlgmr.msra.gmra.mrb[12].mxu0 %vm417_vm2, %v790_v35 }
 0x524   : > { %v593_v36 = vpop.f32.mrb[4].mxu0 }
 0x525   : > { %600 = vrot.lane.b32.xlu1 %v593_v36, %s1197_s25  ;;  %v1104_v37 = vpop.f32.mrb[5].mxu0 }
 0x526   : > { %v596_v38 = vpop.f32.mrb[6].mxu0 }
 0x527   : > { %v1105_v39 = vpop.f32.mrb[7].mxu0 }
 0x52c   : > { %v713_v42 = vpop.f32.mrb[8].mxu0 }
 0x52d   : > { %720 = vrot.lane.b32.xlu0 %v713_v42, %s1198_s10  ;;  %v1116_v43 = vpop.f32.mrb[9].mxu0 }
 0x52e   : > { %v716_v44 = vpop.f32.mrb[10].mxu0 }
 0x52f   : > { %v1117_v45 = vpop.f32.mrb[11].mxu0 }
 0x534   : > { %v833_v46 = vpop.f32.mrb[12].mxu0 }
 0x535   : > { %840 = vrot.lane.b32.xlu1 %v833_v46, %s1199_s11  ;;  %v1128_v47 = vpop.f32.mrb[13].mxu0 }
 0x536   : > { %v836_v48 = vpop.f32.mrb[14].mxu0 }
 0x537   : > { %v1129_v49 = vpop.f32.mrb[15].mxu0 }
 0x597   : > { %v601_v50 = vpop.permute.xlu1 %600 }
 0x598   : > { %604 = vst.msk [vmem:[#allocation2] sm:$0xff] %vm603_vm4, %v601_v50 }
 0x59f   : > { %v721_v51 = vpop.permute.xlu0 %720 }
 0x5a0   : > { %724 = vst.msk [vmem:[#allocation2] sm:$0xff] %vm723_vm5, %v721_v51 }
 0x5a7   : > { %v841_v0 = vpop.permute.xlu1 %840 }
 0x5a8   : > { %844 = vst.msk [vmem:[#allocation2] sm:$0xff] %vm843_vm6, %v841_v0 }
 0x5af   : > { %v845_v52 = vld [vmem:[#allocation2] sm:$0xff] }
 0x5b0   : > { %v846_v53 = vpack.c.bf16 %v845_v52, %v845_v52 }
 0x5b2   : > { %1135 = vmatmul.mubr.msk.bf16.vlgmr.msra.gmra.mrb[16].mxu1 %vm870_vm7, %v846_v53 }
 0x685   : > { %v908_v55 = vpop.f32.mrb[16].mxu1 }
 0x686   : > { %v909_v57 = vadd.f32 %v1054_v54, %v908_v55  ;;  %v1136_v58 = vpop.f32.mrb[17].mxu1 }
 0x687   : > { %v911_v59 = vpop.f32.mrb[18].mxu1 }
 0x688   : > { %v1137_v60 = vpop.f32.mrb[19].mxu1  ;;  %v915_v61 = vadd.f32 %v914_v56, %v909_v57 }
 0x68a   : > { %v916_v62 = vsel %vm870_vm7, %v915_v61, 0.0 }
 0x68b   : > { %917 = vadd.xlane.f32.xlu0 %v916_v62 }
 0x718   : > { %v918_v63 = vpop.xlane.xlu0 %917 }
 0x719   : > { %v920_v2 = vmul.f32 0.03125, %v918_v63 }
 0x71b   : > { %v921_v3 = vsub.f32 %v915_v61, %v920_v2 }
 0x71d   : > { %v922_v4 = vmul.f32 %v921_v3, %v921_v3 }
 0x71f   : > { %v923_v6 = vsel %vm870_vm7, %v922_v4, 0.0 }
 0x720   : > { %924 = vadd.xlane.f32.xlu1 %v923_v6 }
 0x7ad   : > { %v925_v7 = vpop.xlane.xlu1 %924 }
 0x7ae   : > { %v926_v8 = vmul.f32 0.03125, %v925_v7 }
 0x7b0   : > { %v927_v9 = vadd.f32 1e-05, %v926_v8 }
 0x7b2   : > { %1178 = vrsqrt.f32 %v927_v9 }
 0x7bc   : > { %v1179_v5 = vpop.eup %1178 }
 0x7bd   : > { %v929_v11 = vmul.f32 %v1179_v5, %v921_v3 }
 0x7bf   : > { %v937_v13 = vmul.f32 %v1058_v10, %v929_v11 }
 0x7c1   : > { %v945_v14 = vadd.f32 %v1059_v12, %v937_v13 }
 0x7c3   : > { %946 = vst.msk [vmem:[%s351_s23] sm:$0xff] %vm870_vm7, %v945_v14 }
 0x7c4 PF: > { %s18_s27 = sadd.s32 1, %s1186_s27  }
 0x7c5   : > { %p15_p4 = scmp.ge.s32.totalorder %s18_s27, 4  }
 0x7c7   :  { %17 = sbr.rel (!%p15_p4) target bundleno = 1 (0x1), region = 91 }

// kernel: text_decode_forward.25
= control target key start
LH: loop header
LB: loop body
LE: loop exit
PB: predicated region body
PF: predicated region fallthrough
CT: control target
= control target key end

     0   :  { %v112_v0 = vmov 0.0   ;;  %vm113_vm0 = vmmov 0   ;;  %vm41_vm1 = vcmask 261120   ;;  %vm86_vm2 = vcmask 130048   ;;  %s155_s1 = inlined_call_operand.vmem [shape: bf16[32,16], index: 1, kind: input, shape index: {}]   ;;  %s156_s0 = inlined_call_operand.vmem [shape: f32[16,32], index: 0, kind: input, shape index: {}]   ;;  %s157_s2 = inlined_call_operand.vmem [shape: f32[1,16], index: 2, kind: input, shape index: {}]   ;;  %s158_s3 = inlined_call_operand.vmem [shape: f32[16,16], index: 3, kind: output, shape index: {}]  }
   0x1   :  { %100 = vmatprep.subr.bf16.mxu0 %v112_v0  ;;  %v110_v1 = vld [vmem:[%s155_s1] sm:$0xff]   ;;  %104 = vmatprep.mubr.msk.bf16.mxu0 %vm113_vm0, %v112_v0  ;;  %v111_v2 = vld [vmem:[%s155_s1 + $0x8] sm:$0xff]  }
   0x2   :  { %101 = vmatpush3.bf16.msra.mxu0 %v110_v1  ;;  %v15_v3 = vld [vmem:[%s156_s0] sm:$0xff]  ;;  %v16_v4 = vld [vmem:[%s156_s0 + $0x8] sm:$0xff] }
   0x3   :  { %102 = vmatprep.subr.bf16.mxu0 %v112_v0  ;;  %v17_v5 = vpack.c.bf16 %v16_v4, %v15_v3  ;;  %v93_v6 = vld [vmem:[%s157_s2] ss:$0 sm:$0xff] }
   0x6   :  { %103 = vmatpush3.bf16.msra.mxu0 %v111_v2 }
   0x9   :  { %105 = vmatmul.mubr.msk.bf16.vlgmr.msra.gmra.mrb[0].mxu0 %vm41_vm1, %v17_v5 }
  0xdc   :  { %v79_v7 = vpop.f32.mrb[0].mxu0 }
  0xdd   :  { %v80_v8 = vadd.f32 %v93_v6, %v79_v7  ;;  %v106_v9 = vpop.f32.mrb[1].mxu0 }
  0xde   :  { %v82_v10 = vpop.f32.mrb[2].mxu0 }
  0xdf   :  { %87 = vst.msk [vmem:[%s158_s3] sm:$0xff] %vm86_vm2, %v80_v8  ;;  %v83_v11 = vadd.f32 %v93_v6, %v82_v10  ;;  %v107_v12 = vpop.f32.mrb[3].mxu0 }
  0xe1   :  { %88 = vst.msk [vmem:[%s158_s3 + $0x8] sm:$0xff] %vm86_vm2, %v83_v11 }

</bundles_post_ra>
